<compile_context>
chip_gen: v5e
topology: v5e:2x2
jax: 0.10.0
libtpu: 0.0.40
codegen_flags: <defaults>
</compile_context>

<pallas_src>
import jax
import jax.numpy as jnp
from jax.experimental import pallas as pl
from jax.experimental.pallas import tpu as pltpu

FEATURE_DIM = 32          # CFG.feature_dim
HIDDEN_DIM = 64           # CFG.hidden_dim
L1_MID = HIDDEN_DIM * 2   # L1 family: conv1 -> hidden_dim * 2 = 128


def gene_tile_kernel(ax_ref, amc_ref, w1_ref, b1_ref, w2bd_ref, b2_ref, o_ref):
    # ax_ref   : [N, F]        A_norm @ x (precomputed, resident across steps)
    # amc_ref  : [N, 1]        row-mean of A_norm as a column (resident)
    # w1_ref   : [F, T*M1]     conv1 weights of this gene tile, lane-concatenated
    # b1_ref   : [1, T*M1]     conv1 biases, lane-concatenated
    # w2bd_ref : [T*M1, T*H]   block-diagonal folded (W2 @ Wrt) * activity_factor
    # b2_ref   : [1, T*H]      folded (b2 @ Wrt + brt) * activity_factor, lane-concatenated
    # o_ref    : [1, T*H]      lane-dense output slab for this gene tile

    # conv1 for all genes in the tile at once: [N, F] @ [F, T*M1]  (single MXU op)
    h1 = jnp.dot(ax_ref[...], w1_ref[...], preferred_element_type=jnp.float32) + b1_ref[...]
    h1 = jnp.maximum(h1, 0.0)                                        # [N, T*M1]

    # mean pool folded through the linear tail: z_g = mean_row(A) @ h1_g.
    # Done as a VPU multiply + XLU sublane reduce (MXU stays out of the M=1 matvec).
    z = jnp.sum(h1 * amc_ref[...], axis=0, keepdims=True)            # [1, T*M1]

    # folded conv2 + reverse_transcriptase + activity scaling for the whole tile:
    # one K=T*M1, N=T*H matmul against the block-diagonal weights, one lane-dense store.
    o_ref[...] = (jnp.dot(z, w2bd_ref[...], preferred_element_type=jnp.float32)
                  + b2_ref[...])


def gene_forward_batch(x, a_norm, w1, b1, w2, b2, wrt, brt, ages, *, gene_tile=8):
    """Forward pass for a population of G L1-family genes sharing one graph.

    x      : [N, F]        node features
    a_norm : [N, N]        dense normalized adjacency D^-1/2 (A+I) D^-1/2
    w1     : [G, F, M1]    conv1 weights (stored so the op is x @ w1[g])
    b1     : [G, M1]
    w2     : [G, M1, H]    conv2 weights
    b2     : [G, H]
    wrt    : [G, H, H]     reverse_transcriptase weights
    brt    : [G, H]
    ages   : [G]           gene ages (activity_factor = 1/(1+age*0.01))
    returns: [G, H]
    """
    G, F, M1 = w1.shape
    H = w2.shape[2]
    N = x.shape[0]
    T = gene_tile

    af = 1.0 / (1.0 + ages.astype(jnp.float32) * 0.01)                        # [G]

    # Fold conv2 @ reverse_transcriptase @ activity_factor (exact: no nonlinearity between).
    w2p = jnp.einsum('gmh,ghk->gmk', w2, wrt) * af[:, None, None]             # [G, M1, H]
    b2p = (jnp.einsum('gh,ghk->gk', b2, wrt) + brt) * af[:, None]             # [G, H]

    # Gene-independent precompute: A@X (hoisted out of every grid step) and the
    # mean-pool fold mean_rows(A@Y) == mean_row(A) @ Y, passed as a column for a
    # VPU/XLU sublane reduce in-kernel.
    ax = jnp.dot(a_norm, x, preferred_element_type=jnp.float32)               # [N, F]
    a_mean_col = jnp.mean(a_norm, axis=0)[:, None]                            # [N, 1]

    # Pad gene axis to a multiple of gene_tile (zero genes produce zero rows, sliced off).
    g_pad = ((G + T - 1) // T) * T
    pad = g_pad - G
    if pad:
        w1 = jnp.pad(w1, ((0, pad), (0, 0), (0, 0)))
        b1 = jnp.pad(b1, ((0, pad), (0, 0)))
        w2p = jnp.pad(w2p, ((0, pad), (0, 0), (0, 0)))
        b2p = jnp.pad(b2p, ((0, pad), (0, 0)))
    num_tiles = g_pad // T

    # Lane-concatenate conv1 params so each grid step does one big lane-dense matmul.
    w1f = jnp.transpose(w1, (1, 0, 2)).reshape(F, g_pad * M1)                 # [F, Gp*M1]
    b1f = b1.reshape(1, g_pad * M1)                                           # [1, Gp*M1]

    # Pack the folded second stage as a per-tile block-diagonal [T*M1, T*H] so the whole
    # tile is one lane-dense matmul with a single [1, T*H] result row.
    eye = jnp.eye(T, dtype=jnp.float32)
    w2bd = jnp.einsum('tgmh,gk->tgmkh', w2p.reshape(num_tiles, T, M1, H), eye)
    w2bd = w2bd.reshape(num_tiles, T * M1, T * H)                             # [nt, T*M1, T*H]
    b2f = b2p.reshape(num_tiles, 1, T * H)                                    # [nt, 1, T*H]

    out = pl.pallas_call(
        gene_tile_kernel,
        out_shape=jax.ShapeDtypeStruct((num_tiles, 1, T * H), jnp.float32),
        grid=(num_tiles,),
        in_specs=[
            pl.BlockSpec((N, F), lambda t: (0, 0)),                    # AX        (resident)
            pl.BlockSpec((N, 1), lambda t: (0, 0)),                    # a_mean col(resident)
            pl.BlockSpec((F, T * M1), lambda t: (0, t)),               # w1f  per gene tile
            pl.BlockSpec((1, T * M1), lambda t: (0, t)),               # b1f  per gene tile
            pl.BlockSpec((None, T * M1, T * H), lambda t: (t, 0, 0)),  # w2bd per gene tile
            pl.BlockSpec((None, 1, T * H), lambda t: (t, 0, 0)),       # b2f  per gene tile
        ],
        out_specs=pl.BlockSpec((None, 1, T * H), lambda t: (t, 0, 0)),
        compiler_params=pltpu.CompilerParams(
            dimension_semantics=("parallel",)),                        # v7x: tiles split across TCs
    )(ax, a_mean_col, w1f, b1f, w2bd, b2f)

    # out[t, 0, g*H + h] is gene (t*T + g), feature h  ->  row-major reshape is exact.
    return out.reshape(g_pad, H)[:G]


def build_normalized_adjacency(edge_index, n):
    """Dense D^-1/2 (A + I) D^-1/2 — matches PyG GCNConv gcn_norm(add_self_loops=True)."""
    a = jnp.zeros((n, n), dtype=jnp.float32)
    a = a.at[edge_index[0], edge_index[1]].add(1.0)   # scatter-add: duplicate edges count
    a = a + jnp.eye(n, dtype=jnp.float32)             # added self-loops
    deg = jnp.sum(a, axis=1)
    d_inv_sqrt = jnp.where(deg > 0, 1.0 / jnp.sqrt(deg), 0.0)   # isolated nodes -> 0
    return a * d_inv_sqrt[:, None] * d_inv_sqrt[None, :]


def reference_forward_one(x, a_norm, w1_g, b1_g, w2_g, b2_g, wrt_g, brt_g, age_g):
    """Literal (unfolded) per-gene forward, for verification."""
    h = jnp.maximum(a_norm @ (x @ w1_g) + b1_g[None, :], 0.0)
    h = a_norm @ (h @ w2_g) + b2_g[None, :]
    h = h @ wrt_g + brt_g[None, :]
    h = jnp.mean(h, axis=0, keepdims=True)
    return h * (1.0 / (1.0 + age_g * 0.01))


if __name__ == "__main__":
    key = jax.random.PRNGKey(0)
    N = 16   # graph nodes
    G = 16   # genes in the population (batched into one pallas_call; grid=(2,))

    # deterministic undirected ring graph
    src = jnp.arange(N, dtype=jnp.int32)
    dst = (src + 1) % N
    edge_index = jnp.stack([jnp.concatenate([src, dst]),
                            jnp.concatenate([dst, src])], axis=0)
    a_norm = build_normalized_adjacency(edge_index, N)

    # deterministic synthetic parameters (shapes from __init__, L1 family), per gene
    ks = jax.random.split(key, 7)
    x   = jax.random.normal(ks[0], (N, FEATURE_DIM), dtype=jnp.float32)
    w1  = jax.random.normal(ks[1], (G, FEATURE_DIM, L1_MID), dtype=jnp.float32) * 0.1
    b1  = jax.random.normal(ks[2], (G, L1_MID), dtype=jnp.float32) * 0.01
    w2  = jax.random.normal(ks[3], (G, L1_MID, HIDDEN_DIM), dtype=jnp.float32) * 0.1
    b2  = jax.random.normal(ks[4], (G, HIDDEN_DIM), dtype=jnp.float32) * 0.01
    wrt = jax.random.normal(ks[5], (G, HIDDEN_DIM, HIDDEN_DIM), dtype=jnp.float32) * 0.1
    brt = jax.random.normal(ks[6], (G, HIDDEN_DIM), dtype=jnp.float32) * 0.01
    ages = jnp.arange(G, dtype=jnp.float32)   # varying ages -> varying activity factors

    out = gene_forward_batch(x, a_norm, w1, b1, w2, b2, wrt, brt, ages)
    out = jax.block_until_ready(out)

    ref = jnp.concatenate(
        [reference_forward_one(x, a_norm, w1[g], b1[g], w2[g], b2[g],
                               wrt[g], brt[g], ages[g]) for g in range(G)],
        axis=0)

    assert out.shape == (G, HIDDEN_DIM)
    assert jnp.allclose(out, ref, atol=1e-3, rtol=1e-3), "mismatch vs reference"

    print("KERNEL_OK")
</pallas_src>

<mosaic_0001>
module attributes {stable_mosaic.version = 11 : i64} {
  func.func @gene_tile_kernel(%arg0: i32, %arg1: memref<16x32xf32, #tpu.memory_space<vmem>>, %arg2: memref<16x1xf32, #tpu.memory_space<vmem>>, %arg3: memref<32x1024xf32, #tpu.memory_space<vmem>>, %arg4: memref<1x1024xf32, #tpu.memory_space<vmem>>, %arg5: memref<1x1024x512xf32, #tpu.memory_space<vmem>>, %arg6: memref<1x1x512xf32, #tpu.memory_space<vmem>>, %arg7: memref<1x1x512xf32, #tpu.memory_space<vmem>>) attributes {dimension_semantics = [#tpu.dimension_semantics<parallel>], iteration_bounds = array<i64: 2>, scalar_prefetch = 0 : i64, scratch_operands = 0 : i64, tpu.core_type = #tpu.core_type<tc>, window_params = [{pipeline_mode = #tpu.pipeline_mode<synchronous>, transform_indices = @transform_0, window_bounds = array<i64: 16, 32>}, {pipeline_mode = #tpu.pipeline_mode<synchronous>, transform_indices = @transform_1, window_bounds = array<i64: 16, 1>}, {transform_indices = @transform_2, window_bounds = array<i64: 32, 1024>}, {transform_indices = @transform_3, window_bounds = array<i64: 1, 1024>}, {transform_indices = @transform_4, window_bounds = array<i64: 1, 1024, 512>}, {transform_indices = @transform_5, window_bounds = array<i64: 1, 1, 512>}, {transform_indices = @transform_6, window_bounds = array<i64: 1, 1, 512>}]} {
    %c0 = arith.constant 0 : index
    %c0_0 = arith.constant 0 : index
    %0 = vector.load %arg1[%c0, %c0_0] : memref<16x32xf32, #tpu.memory_space<vmem>>, vector<16x32xf32>
    %c0_1 = arith.constant 0 : index
    %c0_2 = arith.constant 0 : index
    %1 = vector.load %arg3[%c0_1, %c0_2] : memref<32x1024xf32, #tpu.memory_space<vmem>>, vector<32x1024xf32>
    %cst = arith.constant dense<0.000000e+00> : vector<16x1024xf32>
    %2 = tpu.matmul %0, %1, %cst {dimension_numbers = #tpu.dot_dimension_numbers<[1], [0], [0], [1], [0, 0, 1, 1], [], []>} : vector<16x32xf32>, vector<32x1024xf32>, vector<16x1024xf32> -> vector<16x1024xf32>
    %c0_3 = arith.constant 0 : index
    %c0_4 = arith.constant 0 : index
    %3 = vector.load %arg4[%c0_3, %c0_4] : memref<1x1024xf32, #tpu.memory_space<vmem>>, vector<1x1024xf32>
    %4 = vector.broadcast %3 : vector<1x1024xf32> to vector<16x1024xf32>
    %5 = arith.addf %2, %4 : vector<16x1024xf32>
    %cst_5 = arith.constant 0.000000e+00 : f32
    %6 = vector.broadcast %cst_5 : f32 to vector<16x1024xf32>
    %7 = arith.maximumf %5, %6 : vector<16x1024xf32>
    %c0_6 = arith.constant 0 : index
    %c0_7 = arith.constant 0 : index
    %8 = vector.load %arg2[%c0_6, %c0_7] : memref<16x1xf32, #tpu.memory_space<vmem>>, vector<16x1xf32>
    %9 = vector.broadcast %8 : vector<16x1xf32> to vector<16x1024xf32>
    %10 = arith.mulf %7, %9 : vector<16x1024xf32>
    %cst_8 = arith.constant dense<0.000000e+00> : vector<1024xf32>
    %11 = vector.multi_reduction <add>, %10, %cst_8 [0] : vector<16x1024xf32> to vector<1024xf32>
    %12 = vector.shape_cast %11 : vector<1024xf32> to vector<1x1024xf32>
    %c0_9 = arith.constant 0 : index
    %c0_10 = arith.constant 0 : index
    %c0_11 = arith.constant 0 : index
    %13 = vector.load %arg5[%c0_9, %c0_10, %c0_11] : memref<1x1024x512xf32, #tpu.memory_space<vmem>>, vector<1x1024x512xf32>
    %14 = vector.shape_cast %13 : vector<1x1024x512xf32> to vector<1024x512xf32>
    %cst_12 = arith.constant dense<0.000000e+00> : vector<1x512xf32>
    %15 = tpu.matmul %12, %14, %cst_12 {dimension_numbers = #tpu.dot_dimension_numbers<[1], [0], [0], [1], [0, 0, 1, 1], [], []>} : vector<1x1024xf32>, vector<1024x512xf32>, vector<1x512xf32> -> vector<1x512xf32>
    %c0_13 = arith.constant 0 : index
    %c0_14 = arith.constant 0 : index
    %c0_15 = arith.constant 0 : index
    %16 = vector.load %arg6[%c0_13, %c0_14, %c0_15] : memref<1x1x512xf32, #tpu.memory_space<vmem>>, vector<1x1x512xf32>
    %17 = vector.shape_cast %16 : vector<1x1x512xf32> to vector<1x512xf32>
    %18 = arith.addf %15, %17 : vector<1x512xf32>
    %c0_16 = arith.constant 0 : index
    %c0_17 = arith.constant 0 : index
    %c0_18 = arith.constant 0 : index
    %19 = vector.load %arg7[%c0_16, %c0_17, %c0_18] : memref<1x1x512xf32, #tpu.memory_space<vmem>>, vector<1x1x512xf32>
    %20 = vector.shape_cast %19 : vector<1x1x512xf32> to vector<1x512xf32>
    %21 = vector.shape_cast %18 : vector<1x512xf32> to vector<1x1x512xf32>
    tpu.vector_store %arg7[%c0_16, %c0_17, %c0_18], %21 {strides = array<i32>} : memref<1x1x512xf32, #tpu.memory_space<vmem>>, vector<1x1x512xf32>,
    return
  }
  func.func @transform_0(%arg0: i32) -> (i32, i32) {
    %c0_i32 = arith.constant 0 : i32
    %c0_i32_0 = arith.constant 0 : i32
    %c0_i32_1 = arith.constant 0 : i32
    return %c0_i32, %c0_i32_0 : i32, i32
  }
  func.func @transform_1(%arg0: i32) -> (i32, i32) {
    %c0_i32 = arith.constant 0 : i32
    %c0_i32_0 = arith.constant 0 : i32
    %c0_i32_1 = arith.constant 0 : i32
    return %c0_i32, %c0_i32_0 : i32, i32
  }
  func.func @transform_2(%arg0: i32) -> (i32, i32) {
    %c0_i32 = arith.constant 0 : i32
    %c0_i32_0 = arith.constant 0 : i32
    return %c0_i32, %arg0 : i32, i32
  }
  func.func @transform_3(%arg0: i32) -> (i32, i32) {
    %c0_i32 = arith.constant 0 : i32
    %c0_i32_0 = arith.constant 0 : i32
    return %c0_i32, %arg0 : i32, i32
  }
  func.func @transform_4(%arg0: i32) -> (i32, i32, i32) {
    %c0_i32 = arith.constant 0 : i32
    %c0_i32_0 = arith.constant 0 : i32
    %c0_i32_1 = arith.constant 0 : i32
    return %arg0, %c0_i32, %c0_i32_0 : i32, i32, i32
  }
  func.func @transform_5(%arg0: i32) -> (i32, i32, i32) {
    %c0_i32 = arith.constant 0 : i32
    %c0_i32_0 = arith.constant 0 : i32
    %c0_i32_1 = arith.constant 0 : i32
    return %arg0, %c0_i32, %c0_i32_0 : i32, i32, i32
  }
  func.func @transform_6(%arg0: i32) -> (i32, i32, i32) {
    %c0_i32 = arith.constant 0 : i32
    %c0_i32_0 = arith.constant 0 : i32
    %c0_i32_1 = arith.constant 0 : i32
    return %arg0, %c0_i32, %c0_i32_0 : i32, i32, i32
  }
}

</mosaic_0001>

<bundles_post_ra>
// kernel: tpu_custom_call.1
= control target key start
LH: loop header
LB: loop body
LE: loop exit
PB: predicated region body
PF: predicated region fallthrough
CT: control target
= control target key end

     0   :  { %s3380_s0 = inlined_call_operand.hbm [shape: f32[16,32], index: 0, kind: input, shape index: {}]   ;;  %s3381_s1 = inlined_call_operand.vmem [shape: f32[16,1], index: 1, kind: input, shape index: {}]   ;;  %s3382_s2 = inlined_call_operand.hbm [shape: f32[32,2048], index: 2, kind: input, shape index: {}]   ;;  %s3383_s3 = inlined_call_operand.hbm [shape: f32[1,2048], index: 3, kind: input, shape index: {}]   ;;  %s3384_s4 = inlined_call_operand.hbm [shape: f32[2,1024,512], index: 4, kind: input, shape index: {}]   ;;  %s3385_s5 = inlined_call_operand.hbm [shape: f32[2,1,512], index: 5, kind: input, shape index: {}]   ;;  %s3386_s6 = inlined_call_operand.hbm [shape: f32[2,1,512], index: 6, kind: output, shape index: {}]  }
   0x1   :  { %3390 = sst [smem:[#allocation19_spill]] %s3380_s0 }
   0x2   :  { %3391 = sst [smem:[#allocation20_spill]] %s3382_s2 }
   0x3   :  { %3392 = sst [smem:[#allocation21_spill]] %s3384_s4 }
   0x4   :  { %11 = vsyncpa [#allocation3], 0 }
   0x5   :  { %12 = vsyncpa [#allocation6], 0 }
   0x6   :  { %14 = vsyncpa [#allocation6 + $0x1], 0 }
   0x7   :  { %15 = vsyncpa [#allocation9], 0 }
   0x8   :  { %17 = vsyncpa [#allocation9 + $0x1], 0 }
   0x9   :  { %18 = vsyncpa [#allocation4], 0 }
   0xa   :  { %20 = vsyncpa [#allocation4 + $0x1], 0  ;;  %s2484_s21 = smov 0   ;;  %s2486_s22 = smov 0  }
   0xb   :  { %s2488_s23 = smov 0   ;;  %s2490_s24 = smov 0  }
   0xc LB: > { %3393 = sst [smem:[#allocation16_spill]] %s2434_s23  ;;  %s2505_s25 = sadd.s32 1, %s2438_s24   ;;  %s2438_s24 = sphi %s2490_s24, %s3405_s24   ;;  %s2434_s23 = sphi %s2488_s23, %s3407_s23   ;;  %s2430_s22 = sphi %s2486_s22, %s3409_s22   ;;  %s2426_s21 = sphi %s2484_s21, %s3408_s21  }
   0xd   : > { %3394 = sst [smem:[#allocation17_spill]] %s2505_s25  ;;  %s75_s26 = sadd.s32 1, %s2434_s23 }
   0xe   : > { %s72_s27 = ssub.s32 %s2438_s24, %s2505_s25  ;;  %p82_p0 = scmp.ne.s32.totalorder %s2434_s23, %s2430_s22 }
   0xf   : > { %p73_p1 = scmp.eq.s32.totalorder %s72_s27, 0  ;;  %p83_p2 = scmp.eq.s32.totalorder %s2438_s24, 0 }
  0x10   : > { %p2169_p4 = scmp.lt.s32.totalorder %s2438_s24, 2  ;;  %s233_s29 = sand.u32 1, %s2438_s24  }
  0x11   : > { %s2516_s28 = scalar_select %p73_p1, %s2434_s23, %s75_s26  }
  0x12   : > { %p84_p5 = por %p83_p2, %p82_p0  ;;  %s2523_s30 = sand.u32 1, %s2434_s23  }
  0x13   : > { %3395 = sst [smem:[#allocation18_spill]] %s2516_s28  ;;  %s2094_s7 = sshll.u32 %s2523_s30, 8 }
  0x14   : > { %s2131_s8 = sshll.u32 %s2438_s24, 6  ;;  %s3396_s2 = sld [smem:[#allocation20_spill]] }
  0x15   : > { %s237_s13 = scalar_lea.vmem [#allocation5], %s2094_s7  ;;  %p2532_p6 = pnand %p2169_p4, %p84_p5 }
  0x16   : > { %s245_s14 = sshll.u32 %s237_s13, 4  ;;  %s2538_s16 = scalar_lea.sflag [#allocation6], %s233_s29  ;;  %s246_s14 = int_to_ptr.vmem [resolvable:$true] %s245_s14 }
  0x17   : > { %p2218_p8 = pneg %p2532_p6 }
  0x1a   : > { %s242_s11 = scalar_lea.hbm %s3396_s2, %s2131_s8  ;;  %s2221_s26 = scalar_lea.hbm %s3396_s2, 512 }
  0x1b   : > { %s243_s12 = sshll.u32 %s242_s11, 4  ;;  %s244_s12 = int_to_ptr.hbm [resolvable:$true] %s243_s12 }
  0x1c   : > { %s2214_s17 = sshra.s32 %s244_s12, 4  ;;  %s2215_s17 = int_to_ptr.hbm [resolvable:$true] %s2214_s17 }
  0x1d   : > { %s2216_s18 = scalar_lea.hbm %s2215_s17, 256  ;;  %p2222_p11 = scmp.lt.s32.totalorder %s2215_s17, %s3396_s2 }
  0x1e   : > { %p2217_p7 = scmp.ne.s32.totalorder %s2215_s17, %s2216_s18  ;;  %p2223_p12 = scmp.lt.s32.totalorder %s2221_s26, %s2216_s18 }
  0x20   : > { %p2219_p9 = pnand %p2218_p8, %p2217_p7  ;;  %p2224_p13 = por %p2223_p12, %p2222_p11 }
  0x22   : > { %p2220_p10 = pneg %p2219_p9 }
  0x24   : > { %p2225_p1 = pnand %p2224_p13, %p2220_p10 }
  0x26   : > { %2228 = shalt.err (!%p2225_p1)
}
  0x27   : > { %s2440_s8 = smov 2048   ;;  %s2441_s9 = smov 1024  }
  0x28   : > { %s2442_s10 = smov 64   ;;  %s2099_s11 = sshll.u32 %s2523_s30, 12 }
  0x29   : > { %2154 = dma.hbm_to_vmem [thread:$0]  (!%p2532_p6), %s244_s12, 4096, %s246_s14, %s2538_s16, %s2440_s8, %s2441_s9, %s2442_s10  }
  0x2a   : > { %s2132_s13 = sshll.u32 %s2438_s24, 12  ;;  %s3398_s4 = sld [smem:[#allocation21_spill]] }
  0x2b   : > { %s278_s26 = scalar_lea.vmem [#allocation8], %s2099_s11  ;;  %s2561_s7 = scalar_lea.sflag [#allocation9], %s233_s29 }
  0x2c   : > { %s286_s27 = sshll.u32 %s278_s26, 4  ;;  %s287_s27 = int_to_ptr.vmem [resolvable:$true] %s286_s27 }
  0x30   : > { %s283_s17 = scalar_lea.hbm %s3398_s4, %s2132_s13  ;;  %s2251_s8 = scalar_lea.hbm %s3398_s4, 8192 }
  0x31   : > { %s284_s18 = sshll.u32 %s283_s17, 4  ;;  %s285_s18 = int_to_ptr.hbm [resolvable:$true] %s284_s18 }
  0x32   : > { %s2244_s2 = sshra.s32 %s285_s18, 4  ;;  %s2245_s2 = int_to_ptr.hbm [resolvable:$true] %s2244_s2 }
  0x33   : > { %s2246_s28 = scalar_lea.hbm %s2245_s2, 4096  ;;  %p2252_p7 = scmp.lt.s32.totalorder %s2245_s2, %s3398_s4 }
  0x34   : > { %p2247_p2 = scmp.ne.s32.totalorder %s2245_s2, %s2246_s28  ;;  %p2253_p9 = scmp.lt.s32.totalorder %s2251_s8, %s2246_s28 }
  0x36   : > { %p2249_p4 = pnand %p2247_p2, %p2218_p8  ;;  %p2254_p10 = por %p2253_p9, %p2252_p7 }
  0x38   : > { %p2250_p5 = pneg %p2249_p4 }
  0x3a   : > { %p2255_p11 = pnand %p2254_p10, %p2250_p5 }
  0x3c   : > { %2258 = shalt.err (!%p2255_p11)
}
  0x3d   : > { %s2443_s29 = smov 512   ;;  %s2444_s11 = smov 32  }
  0x3e   : > { %2160 = dma.hbm_to_vmem [thread:$0]  (!%p2532_p6), %s285_s18, 65536, %s287_s27, %s2561_s7, %s2443_s29, %s2443_s29, %s2444_s11  }
  0x3f   : > { %s2576_s13 = sadd.s32 4294967295, %s2438_s24   ;;  %s2090_s2 = sadd.s32 4294967294, %s2438_s24  }
  0x40   : > { %p88_p12 = scmp.ne.s32.totalorder %s2430_s22, %s2426_s21  ;;  %p89_p13 = scmp.eq.s32.totalorder %s2576_s13, 0 }
  0x41   : > { %p190_p1 = scmp.eq.s32.totalorder %s2576_s13, 1  ;;  %p196_p2 = scmp.eq.s32.totalorder %s2090_s2, 1 }
  0x42   : > { %p2585_p4 = por %p89_p13, %p88_p12  ;;  %p2091_p5 = scmp.ge.s32.totalorder %s2438_s24, 1 }
  0x43   : > { %p2593_p7 = por %p190_p1, %p82_p0  ;;  %p2597_p9 = por %p196_p2, %p88_p12 }
  0x44   : > { %p203_p10 = scmp.lt.s32.totalorder %s2438_s24, 3  ;;  %s3402_s0 = sld [smem:[#allocation19_spill]] }
  0x45   : > { %s2445_s12 = smov [#allocation2]   ;;  %s2097_s8 = sshll.u32 %s2523_s30, 3 }
  0x46   : > { %p2605_p11 = pnand %p2091_p5, %p203_p10  ;;  %s216_s14 = sshll.u32 %s2445_s12, 4  ;;  %s217_s14 = int_to_ptr.vmem [resolvable:$true] %s216_s14 }
  0x47   : > { %s2098_s9 = sshll.u32 %s2438_s24, 3  ;;  %s259_s10 = scalar_lea.vmem [#allocation7], %s2097_s8 }
  0x48   : > { %p2147_p0 = pneg %p2605_p11  ;;  %s267_s29 = sshll.u32 %s259_s10, 4  ;;  %s268_s29 = int_to_ptr.vmem [resolvable:$true] %s267_s29 }
  0x49   : > { %s263_s17 = scalar_lea.hbm %s3383_s3, %s2098_s9  ;;  %s2446_s18 = smov 128  }
  0x4a   : > { %s214_s26 = sshll.u32 %s3402_s0, 4  ;;  %p2148_p12 = pnand %p2147_p0, %p89_p13  ;;  %s215_s26 = int_to_ptr.hbm [resolvable:$true] %s214_s26 }
  0x4b   : > { %s2447_s0 = smov 8   ;;  %s265_s4 = sshll.u32 %s263_s17, 4  ;;  %s266_s4 = int_to_ptr.hbm [resolvable:$true] %s265_s4 }
  0x4c   : > { %2150 = dma.hbm_to_vmem [thread:$0]  (!%p2148_p12), %s215_s26, 256, %s217_s14, [#allocation3], %s2446_s18, %s2446_s18, %s2447_s0  }
  0x4d   : > { %s2102_s12 = sshll.u32 %s2523_s30, 2  ;;  %s2304_s23 = sshra.s32 %s266_s4, 4  ;;  %s2305_s23 = int_to_ptr.hbm [resolvable:$true] %s2304_s23 }
  0x4e   : > { %s2306_s25 = scalar_lea.hbm %s2305_s23, 8  ;;  %s2311_s11 = scalar_lea.hbm %s3383_s3, 16 }
  0x4f   : > { %p2307_p1 = scmp.ne.s32.totalorder %s2305_s23, %s2306_s25  ;;  %p2312_p10 = scmp.lt.s32.totalorder %s2305_s23, %s3383_s3 }
  0x50   : > { %p2313_p0 = scmp.lt.s32.totalorder %s2311_s11, %s2306_s25 }
  0x51   : > { %p2309_p2 = pnand %p2307_p1, %p2218_p8 }
  0x52   : > { %p2314_p12 = por %p2313_p0, %p2312_p10 }
  0x53   : > { %p2310_p5 = pneg %p2309_p2 }
  0x55   : > { %p2315_p3 = pnand %p2314_p12, %p2310_p5 }
  0x57   : > { %2318 = shalt.err (!%p2315_p3)
}
  0x58   : > { %2157 = dma.hbm_to_vmem [thread:$0]  (!%p2532_p6), %s266_s4, 128, %s268_s29, %s2538_s16  }
  0x59   : > { %s2103_s0 = sshll.u32 %s2438_s24, 2  ;;  %s300_s17 = scalar_lea.vmem [#allocation10], %s2102_s12 }
  0x5a   : > { %s304_s14 = scalar_lea.hbm %s3385_s5, %s2103_s0  ;;  %s308_s18 = sshll.u32 %s300_s17, 4  ;;  %s309_s18 = int_to_ptr.vmem [resolvable:$true] %s308_s18 }
  0x5b   : > { %s306_s8 = sshll.u32 %s304_s14, 4  ;;  %s2341_s16 = scalar_lea.hbm %s3385_s5, 8  ;;  %s307_s8 = int_to_ptr.hbm [resolvable:$true] %s306_s8 }
  0x5c   : > { %s2334_s23 = sshra.s32 %s307_s8, 4  ;;  %s2335_s23 = int_to_ptr.hbm [resolvable:$true] %s2334_s23 }
  0x5d   : > { %s2336_s25 = scalar_lea.hbm %s2335_s23, 4  ;;  %p2342_p5 = scmp.lt.s32.totalorder %s2335_s23, %s3385_s5 }
  0x5e   : > { %p2337_p3 = scmp.ne.s32.totalorder %s2335_s23, %s2336_s25  ;;  %p2343_p10 = scmp.lt.s32.totalorder %s2341_s16, %s2336_s25 }
  0x60   : > { %p2339_p1 = pnand %p2337_p3, %p2218_p8  ;;  %p2344_p0 = por %p2343_p10, %p2342_p5 }
  0x62   : > { %p2340_p2 = pneg %p2339_p1 }
  0x64   : > { %p2345_p12 = pnand %p2344_p0, %p2340_p2 }
  0x66   : > { %2348 = shalt.err (!%p2345_p12)
}
  0x67   : > { %2163 = dma.hbm_to_vmem [thread:$0]  (!%p2532_p6), %s307_s8, 64, %s309_s18, %s2561_s7  }
  0x68   : > { %317 = sbr.rel (%p2605_p11) target bundleno = 701 (0x2bd), region = 44 }
  0x6d   : > { %2409 = dma.done.wait (%p89_p13), [#allocation3], 256  }
  0x6e   : > { %2411 = vsyncadd (%p89_p13), [#allocation3], 4294967040  ;;  %s324_s12 = sand.u32 1, %s2576_s13   ;;  %s2655_s9 = sand.u32 1, %s2430_s22  }
  0x6f   : > { %s2106_s2 = sshll.u32 %s2655_s9, 8  ;;  %s325_s15 = scalar_lea.sflag [#allocation6], %s324_s12 }
  0x70   : > { %s2658_s0 = scalar_lea.vmem [#allocation5], %s2106_s2 }
  0x71   : > { %2413 = dma.done.wait (%p2585_p4), %s325_s15, 4224  }
  0x72   : > { %2415 = vsyncadd (%p2585_p4), %s325_s15, 4294963072  ;;  %s2107_s7 = sshll.u32 %s2655_s9, 3  ;;  %s2108_s27 = sshll.u32 %s2655_s9, 12 }
  0x73   : > { %s2666_s30 = scalar_lea.vmem [#allocation7], %s2107_s7  ;;  %s345_s26 = scalar_lea.sflag [#allocation9], %s324_s12 }
  0x74   : > { %s2668_s14 = scalar_lea.vmem [#allocation8], %s2108_s27 }
  0x75   : > { %2417 = dma.done.wait (%p2585_p4), %s345_s26, 65600  }
  0x76   : > { %2419 = vsyncadd (%p2585_p4), %s345_s26, 4294901696  ;;  %v2448_v0 = vmov 0   ;;  %v431_v1 = vld [vmem:[%s2658_s0 + $0xc0] sm:$0xff]  ;;  %v432_v2 = vld [vmem:[%s2658_s0 + $0xc8] sm:$0xff]  ;;  %vm457_vm0 = vcmask 261120   ;;  %s2109_s23 = sshll.u32 %s2655_s9, 2 }
  0x77   : > { %2213 = vset.pattern.permute.xlu0 %v2448_v0  ;;  %v433_v3 = vld [vmem:[%s2658_s0 + $0xd0] sm:$0xff]  ;;  %476 = vmatpush.msra.mxu0 %v431_v1  ;;  %v434_v4 = vld [vmem:[%s2658_s0 + $0xd8] sm:$0xff]  ;;  %v423_v5 = vld [vmem:[%s2658_s0 + $0x80] sm:$0xff]  ;;  %s358_s25 = scalar_lea.vmem [#allocation10], %s2109_s23  ;;  %s2128_s10 = sshll.u32 %s2576_s13, 2  ;;  %vm1917_vm1 = vcmask 1040384  }
  0x78   : > { %499 = vmatpush.msra.mxu1 %v432_v2  ;;  %v424_v6 = vld [vmem:[%s2658_s0 + $0x88] sm:$0xff]  ;;  %522 = vmatpush.msra.mxu2 %v433_v3  ;;  %v425_v7 = vld [vmem:[%s2658_s0 + $0x90] sm:$0xff]  ;;  %v426_v8 = vld [vmem:[%s2658_s0 + $0x98] sm:$0xff]  ;;  %s1940_s29 = scalar_lea.hbm %s3386_s6, %s2128_s10  ;;  %vm1919_vm2 = vcmask 1042434   ;;  %s402_s13 = scalar_lea.vmem [#allocation11], %s2109_s23  ;;  %vm1921_vm3 = vcmask 1041408  }
  0x79   : > { %545 = vmatpush.msra.mxu3 %v434_v4  ;;  %v415_v9 = vld [vmem:[%s2658_s0 + $0x40] sm:$0xff]  ;;  %477 = vmatpush.msra.mxu0 %v423_v5  ;;  %v416_v10 = vld [vmem:[%s2658_s0 + $0x48] sm:$0xff]  ;;  %v417_v11 = vld [vmem:[%s2658_s0 + $0x50] sm:$0xff]  ;;  %s1942_s11 = sshll.u32 %s402_s13, 4  ;;  %s1944_s12 = sshll.u32 %s1940_s29, 4  ;;  %s1943_s11 = int_to_ptr.vmem [resolvable:$true] %s1942_s11  ;;  %s1945_s12 = int_to_ptr.hbm [resolvable:$true] %s1944_s12 }
  0x7a   : > { %500 = vmatpush.msra.mxu1 %v424_v6  ;;  %v418_v12 = vld [vmem:[%s2658_s0 + $0x58] sm:$0xff]  ;;  %523 = vmatpush.msra.mxu2 %v425_v7  ;;  %v407_v13 = vld [vmem:[%s2658_s0] sm:$0xff]  ;;  %v408_v14 = vld [vmem:[%s2658_s0 + $0x8] sm:$0xff]  ;;  %s1930_s2 = scalar_lea.sflag [#allocation4], %s2655_s9  ;;  %s2378_s15 = sshra.s32 %s1945_s12, 4  ;;  %s2379_s15 = int_to_ptr.hbm [resolvable:$true] %s2378_s15 }
  0x7b   : > { %546 = vmatpush.msra.mxu3 %v426_v8  ;;  %478 = vmatpush.msra.mxu0 %v415_v9  ;;  %v409_v15 = vld [vmem:[%s2658_s0 + $0x10] sm:$0xff]  ;;  %v410_v16 = vld [vmem:[%s2658_s0 + $0x18] sm:$0xff]  ;;  %v435_v18 = vld [vmem:[%s2658_s0 + $0xe0] sm:$0xff]  ;;  %p2385_p4 = scmp.lt.s32.totalorder %s2379_s15, %s3386_s6 }
  0x7c   : > { %501 = vmatpush.msra.mxu1 %v416_v10  ;;  %524 = vmatpush.msra.mxu2 %v417_v11  ;;  %v2690_v17 = vld [vmem:[#allocation2] sm:$0xff]  ;;  %v436_v19 = vld [vmem:[%s2658_s0 + $0xe8] sm:$0xff]  ;;  %v438_v21 = vld [vmem:[%s2658_s0 + $0xf8] sm:$0xff] }
  0x7d   : > { %547 = vmatpush.msra.mxu3 %v418_v12  ;;  %479 = vmatpush.msra.mxu0 %v407_v13  ;;  %v437_v20 = vld [vmem:[%s2658_s0 + $0xf0] sm:$0xff]  ;;  %v427_v22 = vld [vmem:[%s2658_s0 + $0xa0] sm:$0xff]  ;;  %v428_v23 = vld [vmem:[%s2658_s0 + $0xa8] sm:$0xff] }
  0x7e   : > { %502 = vmatpush.msra.mxu1 %v408_v14  ;;  %525 = vmatpush.msra.mxu2 %v409_v15  ;;  %v429_v24 = vld [vmem:[%s2658_s0 + $0xb0] sm:$0xff]  ;;  %v430_v25 = vld [vmem:[%s2658_s0 + $0xb8] sm:$0xff]  ;;  %v419_v27 = vld [vmem:[%s2658_s0 + $0x60] sm:$0xff] }
  0x7f   : > { %548 = vmatpush.msra.mxu3 %v410_v16  ;;  %2111 = vmatmul.msk.f32.vlgmr.msra.gmra.mxu0 %vm457_vm0, %v2690_v17  ;;  %v664_v26 = vld [vmem:[%s3381_s1] sm:$0xff]  ;;  %v420_v28 = vld [vmem:[%s2658_s0 + $0x68] sm:$0xff]  ;;  %v2714_v30 = vld [vmem:[#allocation2 + $0x8] sm:$0xff] }
  0x80   : > { %2113 = vmatmul.msk.f32.vlgmr.msra.gmra.mxu1 %vm457_vm0, %v2690_v17  ;;  %2115 = vmatmul.msk.f32.vlgmr.msra.gmra.mxu2 %vm457_vm0, %v2690_v17  ;;  %v421_v29 = vld [vmem:[%s2658_s0 + $0x70] sm:$0xff]  ;;  %v422_v31 = vld [vmem:[%s2658_s0 + $0x78] sm:$0xff]  ;;  %v411_v32 = vld [vmem:[%s2658_s0 + $0x20] sm:$0xff] }
  0x81   : > { %2117 = vmatmul.msk.f32.vlgmr.msra.gmra.mxu3 %vm457_vm0, %v2690_v17  ;;  %568 = vmatpush.msrb.mxu0 %v435_v18  ;;  %v412_v33 = vld [vmem:[%s2658_s0 + $0x28] sm:$0xff]  ;;  %v413_v34 = vld [vmem:[%s2658_s0 + $0x30] sm:$0xff]  ;;  %v414_v35 = vld [vmem:[%s2658_s0 + $0x38] sm:$0xff]  ;;  %s2380_s0 = scalar_lea.hbm %s2379_s15, 4 }
  0x82   : > { %591 = vmatpush.msrb.mxu1 %v436_v19  ;;  %614 = vmatpush.msrb.mxu2 %v437_v20  ;;  %v808_v36 = vld [vmem:[%s2668_s14 + $0x1e0] sm:$0xff]  ;;  %v665_v39 = vld [vmem:[%s3381_s1 + $0x8] sm:$0xff]  ;;  %p2381_p6 = scmp.ne.s32.totalorder %s2379_s15, %s2380_s0 }
  0x83   : > { %637 = vmatpush.msrb.mxu3 %v438_v21  ;;  %569 = vmatpush.msrb.mxu0 %v427_v22  ;;  %v872_v37 = vld [vmem:[%s2668_s14 + $0x3e0] sm:$0xff] }
  0x84   : > { %592 = vmatpush.msrb.mxu1 %v428_v23  ;;  %615 = vmatpush.msrb.mxu2 %v429_v24  ;;  %v936_v38 = vld [vmem:[%s2668_s14 + $0x5e0] sm:$0xff]  ;;  %p2382_p8 = pnand %p2381_p6, %p2593_p7 }
  0x85   : > { %638 = vmatpush.msrb.mxu3 %v430_v25  ;;  %668 = vperm.xlu0 %2213, %v664_v26   ;;  %v804_v40 = vld [vmem:[%s2668_s14 + $0x1c0] sm:$0xff] }
  0x86   : > { %570 = vmatpush.msrb.mxu0 %v419_v27  ;;  %593 = vmatpush.msrb.mxu1 %v420_v28  ;;  %v868_v41 = vld [vmem:[%s2668_s14 + $0x3c0] sm:$0xff]  ;;  %p2383_p13 = pneg %p2382_p8 }
  0x87   : > { %616 = vmatpush.msrb.mxu2 %v421_v29  ;;  %2112 = vmatmul.msk.f32.gmra.mxu0 %vm457_vm0, %v2714_v30  ;;  %v1000_v42 = vld [vmem:[%s2668_s14 + $0x7e0] sm:$0xff] }
  0x88   : > { %2114 = vmatmul.msk.f32.gmra.mxu1 %vm457_vm0, %v2714_v30  ;;  %2116 = vmatmul.msk.f32.gmra.mxu2 %vm457_vm0, %v2714_v30  ;;  %v800_v43 = vld [vmem:[%s2668_s14 + $0x1a0] sm:$0xff] }
  0x89   : > { %2118 = vmatmul.msk.f32.gmra.mxu3 %vm457_vm0, %v2714_v30  ;;  %571 = vmatpush.msrb.mxu0 %v411_v32  ;;  %v864_v44 = vld [vmem:[%s2668_s14 + $0x3a0] sm:$0xff] }
  0x8a   : > { %639 = vmatpush.msrb.mxu3 %v422_v31  ;;  %594 = vmatpush.msrb.mxu1 %v412_v33  ;;  %v932_v45 = vld [vmem:[%s2668_s14 + $0x5c0] sm:$0xff] }
  0x8b   : > { %617 = vmatpush.msrb.mxu2 %v413_v34  ;;  %1270 = vmatpush.msra.mxu0 %v808_v36  ;;  %v996_v46 = vld [vmem:[%s2668_s14 + $0x7c0] sm:$0xff] }
  0x8c   : > { %640 = vmatpush.msrb.mxu3 %v414_v35  ;;  %1290 = vmatpush.msra.mxu1 %v872_v37  ;;  %v796_v47 = vld [vmem:[%s2668_s14 + $0x180] sm:$0xff] }
  0x8d   : > { %1310 = vmatpush.msra.mxu2 %v936_v38  ;;  %673 = vperm.xlu0 %2213, %v665_v39   ;;  %v860_v48 = vld [vmem:[%s2668_s14 + $0x380] sm:$0xff] }
  0x8e   : > { %1271 = vmatpush.msra.mxu0 %v804_v40  ;;  %1291 = vmatpush.msra.mxu1 %v868_v41  ;;  %v928_v49 = vld [vmem:[%s2668_s14 + $0x5a0] sm:$0xff] }
  0x8f   : > { %1330 = vmatpush.msra.mxu3 %v1000_v42  ;;  %2119 = vmatmul.msk.f32.vlgmr.msrb.gmra.mxu0 %vm457_vm0, %v2690_v17  ;;  %v992_v50 = vld [vmem:[%s2668_s14 + $0x7a0] sm:$0xff] }
  0x90   : > { %2121 = vmatmul.msk.f32.vlgmr.msrb.gmra.mxu1 %vm457_vm0, %v2690_v17  ;;  %2123 = vmatmul.msk.f32.vlgmr.msrb.gmra.mxu2 %vm457_vm0, %v2690_v17  ;;  %v792_v51 = vld [vmem:[%s2668_s14 + $0x160] sm:$0xff] }
  0x91   : > { %2125 = vmatmul.msk.f32.vlgmr.msrb.gmra.mxu3 %vm457_vm0, %v2690_v17  ;;  %1272 = vmatpush.msra.mxu0 %v800_v43  ;;  %v856_v52 = vld [vmem:[%s2668_s14 + $0x360] sm:$0xff] }
  0x92   : > { %1292 = vmatpush.msra.mxu1 %v864_v44  ;;  %1311 = vmatpush.msra.mxu2 %v932_v45  ;;  %v924_v53 = vld [vmem:[%s2668_s14 + $0x580] sm:$0xff] }
  0x93   : > { %1331 = vmatpush.msra.mxu3 %v996_v46  ;;  %1273 = vmatpush.msra.mxu0 %v796_v47  ;;  %v988_v54 = vld [vmem:[%s2668_s14 + $0x780] sm:$0xff] }
  0x94   : > { %1293 = vmatpush.msra.mxu1 %v860_v48  ;;  %1312 = vmatpush.msra.mxu2 %v928_v49  ;;  %v788_v55 = vld [vmem:[%s2668_s14 + $0x140] sm:$0xff] }
  0x95   : > { %1332 = vmatpush.msra.mxu3 %v992_v50  ;;  %1274 = vmatpush.msra.mxu0 %v792_v51  ;;  %v852_v56 = vld [vmem:[%s2668_s14 + $0x340] sm:$0xff] }
  0x96   : > { %1294 = vmatpush.msra.mxu1 %v856_v52  ;;  %1313 = vmatpush.msra.mxu2 %v924_v53  ;;  %v920_v57 = vld [vmem:[%s2668_s14 + $0x560] sm:$0xff] }
  0x97   : > { %1333 = vmatpush.msra.mxu3 %v988_v54  ;;  %2120 = vmatmul.msk.f32.gmra.mxu0 %vm457_vm0, %v2714_v30  ;;  %v984_v58 = vld [vmem:[%s2668_s14 + $0x760] sm:$0xff] }
  0x98   : > { %2122 = vmatmul.msk.f32.gmra.mxu1 %vm457_vm0, %v2714_v30  ;;  %2124 = vmatmul.msk.f32.gmra.mxu2 %vm457_vm0, %v2714_v30  ;;  %v784_v59 = vld [vmem:[%s2668_s14 + $0x120] sm:$0xff] }
  0x99   : > { %2126 = vmatmul.msk.f32.gmra.mxu3 %vm457_vm0, %v2714_v30  ;;  %v848_v60 = vld [vmem:[%s2668_s14 + $0x320] sm:$0xff]  ;;  %1275 = vmatpush.msra.mxu0 %v788_v55 }
  0x9a   : > { %1295 = vmatpush.msra.mxu1 %v852_v56  ;;  %v916_v61 = vld [vmem:[%s2668_s14 + $0x540] sm:$0xff]  ;;  %1314 = vmatpush.msra.mxu2 %v920_v57 }
  0x9b   : > { %v980_v62 = vld [vmem:[%s2668_s14 + $0x740] sm:$0xff]  ;;  %1334 = vmatpush.msra.mxu3 %v984_v58  ;;  %1276 = vmatpush.msra.mxu0 %v784_v59 }
  0x9c   : > { %v780_v63 = vld [vmem:[%s2668_s14 + $0x100] sm:$0xff]  ;;  %1296 = vmatpush.msra.mxu1 %v848_v60  ;;  %1315 = vmatpush.msra.mxu2 %v916_v61 }
  0x9d   : > { %v844_v0 = vld [vmem:[%s2668_s14 + $0x300] sm:$0xff]  ;;  %1335 = vmatpush.msra.mxu3 %v980_v62  ;;  %1277 = vmatpush.msra.mxu0 %v780_v63 }
  0x9e   : > { %v912_v1 = vld [vmem:[%s2668_s14 + $0x520] sm:$0xff]  ;;  %1297 = vmatpush.msra.mxu1 %v844_v0 }
  0x9f   : > { %v976_v2 = vld [vmem:[%s2668_s14 + $0x720] sm:$0xff]  ;;  %1316 = vmatpush.msra.mxu2 %v912_v1 }
  0xa0   : > { %v776_v3 = vld [vmem:[%s2668_s14 + $0xe0] sm:$0xff]  ;;  %1336 = vmatpush.msra.mxu3 %v976_v2 }
  0xa1   : > { %v840_v4 = vld [vmem:[%s2668_s14 + $0x2e0] sm:$0xff]  ;;  %1278 = vmatpush.msra.mxu0 %v776_v3 }
  0xa2   : > { %v908_v5 = vld [vmem:[%s2668_s14 + $0x500] sm:$0xff]  ;;  %1298 = vmatpush.msra.mxu1 %v840_v4 }
  0xa3   : > { %v972_v6 = vld [vmem:[%s2668_s14 + $0x700] sm:$0xff]  ;;  %1317 = vmatpush.msra.mxu2 %v908_v5 }
  0xa4   : > { %v772_v7 = vld [vmem:[%s2668_s14 + $0xc0] sm:$0xff]  ;;  %1337 = vmatpush.msra.mxu3 %v972_v6 }
  0xa5   : > { %v836_v8 = vld [vmem:[%s2668_s14 + $0x2c0] sm:$0xff]  ;;  %1279 = vmatpush.msra.mxu0 %v772_v7 }
  0xa6   : > { %v904_v9 = vld [vmem:[%s2668_s14 + $0x4e0] sm:$0xff]  ;;  %1299 = vmatpush.msra.mxu1 %v836_v8 }
  0xa7   : > { %v968_v10 = vld [vmem:[%s2668_s14 + $0x6e0] sm:$0xff]  ;;  %1318 = vmatpush.msra.mxu2 %v904_v9 }
  0xa8   : > { %v768_v11 = vld [vmem:[%s2668_s14 + $0xa0] sm:$0xff]  ;;  %1338 = vmatpush.msra.mxu3 %v968_v10 }
  0xa9   : > { %v832_v12 = vld [vmem:[%s2668_s14 + $0x2a0] sm:$0xff]  ;;  %1280 = vmatpush.msra.mxu0 %v768_v11 }
  0xaa   : > { %v900_v13 = vld [vmem:[%s2668_s14 + $0x4c0] sm:$0xff]  ;;  %1300 = vmatpush.msra.mxu1 %v832_v12 }
  0xab   : > { %v964_v14 = vld [vmem:[%s2668_s14 + $0x6c0] sm:$0xff]  ;;  %1319 = vmatpush.msra.mxu2 %v900_v13 }
  0xac   : > { %v764_v15 = vld [vmem:[%s2668_s14 + $0x80] sm:$0xff]  ;;  %1339 = vmatpush.msra.mxu3 %v964_v14 }
  0xad   : > { %v828_v16 = vld [vmem:[%s2668_s14 + $0x280] sm:$0xff]  ;;  %1281 = vmatpush.msra.mxu0 %v764_v15 }
  0xae   : > { %v896_v17 = vld [vmem:[%s2668_s14 + $0x4a0] sm:$0xff]  ;;  %1301 = vmatpush.msra.mxu1 %v828_v16 }
  0xaf   : > { %v960_v18 = vld [vmem:[%s2668_s14 + $0x6a0] sm:$0xff]  ;;  %1320 = vmatpush.msra.mxu2 %v896_v17 }
  0xb0   : > { %v760_v19 = vld [vmem:[%s2668_s14 + $0x60] sm:$0xff]  ;;  %1340 = vmatpush.msra.mxu3 %v960_v18 }
  0xb1   : > { %v824_v20 = vld [vmem:[%s2668_s14 + $0x260] sm:$0xff]  ;;  %1282 = vmatpush.msra.mxu0 %v760_v19 }
  0xb2   : > { %v892_v21 = vld [vmem:[%s2668_s14 + $0x480] sm:$0xff]  ;;  %1302 = vmatpush.msra.mxu1 %v824_v20 }
  0xb3   : > { %v956_v22 = vld [vmem:[%s2668_s14 + $0x680] sm:$0xff]  ;;  %1321 = vmatpush.msra.mxu2 %v892_v21 }
  0xb4   : > { %v756_v23 = vld [vmem:[%s2668_s14 + $0x40] sm:$0xff]  ;;  %1341 = vmatpush.msra.mxu3 %v956_v22 }
  0xb5   : > { %v820_v24 = vld [vmem:[%s2668_s14 + $0x240] sm:$0xff]  ;;  %1283 = vmatpush.msra.mxu0 %v756_v23 }
  0xb6   : > { %v888_v25 = vld [vmem:[%s2668_s14 + $0x460] sm:$0xff]  ;;  %1303 = vmatpush.msra.mxu1 %v820_v24 }
  0xb7   : > { %v952_v26 = vld [vmem:[%s2668_s14 + $0x660] sm:$0xff]  ;;  %1322 = vmatpush.msra.mxu2 %v888_v25 }
  0xb8   : > { %v752_v27 = vld [vmem:[%s2668_s14 + $0x20] sm:$0xff]  ;;  %1342 = vmatpush.msra.mxu3 %v952_v26 }
  0xb9   : > { %v816_v28 = vld [vmem:[%s2668_s14 + $0x220] sm:$0xff]  ;;  %1284 = vmatpush.msra.mxu0 %v752_v27 }
  0xba   : > { %v884_v29 = vld [vmem:[%s2668_s14 + $0x440] sm:$0xff]  ;;  %1304 = vmatpush.msra.mxu1 %v816_v28 }
  0xbb   : > { %v948_v30 = vld [vmem:[%s2668_s14 + $0x640] sm:$0xff]  ;;  %1323 = vmatpush.msra.mxu2 %v884_v29 }
  0xbc   : > { %v748_v31 = vld [vmem:[%s2668_s14] sm:$0xff]  ;;  %1343 = vmatpush.msra.mxu3 %v948_v30 }
  0xbd   : > { %v812_v32 = vld [vmem:[%s2668_s14 + $0x200] sm:$0xff]  ;;  %1285 = vmatpush.msra.mxu0 %v748_v31  ;;  %v2871_v31 = vld [vmem:[%s2666_s30] sm:$0xff]  ;;  %s2384_s30 = scalar_lea.hbm %s3386_s6, 8 }
  0xbe   : > { %v1064_v33 = vld [vmem:[%s2668_s14 + $0x9e0] sm:$0xff]  ;;  %1305 = vmatpush.msra.mxu1 %v812_v32  ;;  %p2386_p11 = scmp.lt.s32.totalorder %s2384_s30, %s2380_s0 }
  0xbf   : > { %v1128_v34 = vld [vmem:[%s2668_s14 + $0xbe0] sm:$0xff]  ;;  %1350 = vmatpush.msrb.mxu0 %v1064_v33 }
  0xc0   : > { %1370 = vmatpush.msrb.mxu1 %v1128_v34  ;;  %v1060_v35 = vld [vmem:[%s2668_s14 + $0x9c0] sm:$0xff]  ;;  %p2387_p3 = por %p2386_p11, %p2385_p4 }
  0xc1   : > { %v1124_v36 = vld [vmem:[%s2668_s14 + $0xbc0] sm:$0xff]  ;;  %1351 = vmatpush.msrb.mxu0 %v1060_v35 }
  0xc2   : > { %1371 = vmatpush.msrb.mxu1 %v1124_v36  ;;  %v880_v37 = vld [vmem:[%s2668_s14 + $0x420] sm:$0xff]  ;;  %p2388_p1 = pnand %p2387_p3, %p2383_p13 }
  0xc3   : > { %v944_v38 = vld [vmem:[%s2668_s14 + $0x620] sm:$0xff]  ;;  %1324 = vmatpush.msra.mxu2 %v880_v37 }
  0xc4   : > { %1344 = vmatpush.msra.mxu3 %v944_v38  ;;  %v1056_v39 = vld [vmem:[%s2668_s14 + $0x9a0] sm:$0xff]  ;;  %v441_v38 = vperm.slane %v2871_v31, 0 }
  0xc5   : > { %v1120_v40 = vld [vmem:[%s2668_s14 + $0xba0] sm:$0xff]  ;;  %1352 = vmatpush.msrb.mxu0 %v1056_v39  ;;  %v442_v39 = vperm.slane %v2871_v31, 1 }
  0xc6   : > { %1372 = vmatpush.msrb.mxu1 %v1120_v40  ;;  %v876_v41 = vld [vmem:[%s2668_s14 + $0x400] sm:$0xff] }
  0xc7   : > { %v940_v42 = vld [vmem:[%s2668_s14 + $0x600] sm:$0xff]  ;;  %1325 = vmatpush.msra.mxu2 %v876_v41 }
  0xc8   : > { %v1052_v43 = vld [vmem:[%s2668_s14 + $0x980] sm:$0xff]  ;;  %1345 = vmatpush.msra.mxu3 %v940_v42 }
  0xc9   : > { %v1116_v44 = vld [vmem:[%s2668_s14 + $0xb80] sm:$0xff]  ;;  %1353 = vmatpush.msrb.mxu0 %v1052_v43 }
  0xca   : > { %v1192_v45 = vld [vmem:[%s2668_s14 + $0xde0] sm:$0xff]  ;;  %1373 = vmatpush.msrb.mxu1 %v1116_v44 }
  0xcb   : > { %v1256_v46 = vld [vmem:[%s2668_s14 + $0xfe0] sm:$0xff]  ;;  %1390 = vmatpush.msrb.mxu2 %v1192_v45  ;;  %v443_v45 = vperm.slane %v2871_v31, 2 }
  0xcc   : > { %1410 = vmatpush.msrb.mxu3 %v1256_v46  ;;  %v1048_v47 = vld [vmem:[%s2668_s14 + $0x960] sm:$0xff] }
  0xcd   : > { %v1112_v48 = vld [vmem:[%s2668_s14 + $0xb60] sm:$0xff]  ;;  %1354 = vmatpush.msrb.mxu0 %v1048_v47  ;;  %v444_v47 = vperm.slane %v2871_v31, 3 }
  0xce   : > { %v1188_v49 = vld [vmem:[%s2668_s14 + $0xdc0] sm:$0xff]  ;;  %1374 = vmatpush.msrb.mxu1 %v1112_v48 }
  0xcf   : > { %v1252_v50 = vld [vmem:[%s2668_s14 + $0xfc0] sm:$0xff]  ;;  %1391 = vmatpush.msrb.mxu2 %v1188_v49 }
  0xd0   : > { %1411 = vmatpush.msrb.mxu3 %v1252_v50  ;;  %v1044_v51 = vld [vmem:[%s2668_s14 + $0x940] sm:$0xff] }
  0xd1   : > { %v1108_v52 = vld [vmem:[%s2668_s14 + $0xb40] sm:$0xff]  ;;  %1355 = vmatpush.msrb.mxu0 %v1044_v51 }
  0xd2   : > { %v1184_v53 = vld [vmem:[%s2668_s14 + $0xda0] sm:$0xff]  ;;  %1375 = vmatpush.msrb.mxu1 %v1108_v52 }
  0xd3   : > { %v1248_v54 = vld [vmem:[%s2668_s14 + $0xfa0] sm:$0xff]  ;;  %1392 = vmatpush.msrb.mxu2 %v1184_v53 }
  0xd4   : > { %1412 = vmatpush.msrb.mxu3 %v1248_v54  ;;  %v1040_v55 = vld [vmem:[%s2668_s14 + $0x920] sm:$0xff] }
  0xd5   : > { %v1104_v56 = vld [vmem:[%s2668_s14 + $0xb20] sm:$0xff]  ;;  %1356 = vmatpush.msrb.mxu0 %v1040_v55 }
  0xd6   : > { %v1180_v57 = vld [vmem:[%s2668_s14 + $0xd80] sm:$0xff]  ;;  %1376 = vmatpush.msrb.mxu1 %v1104_v56 }
  0xd7   : > { %v1244_v58 = vld [vmem:[%s2668_s14 + $0xf80] sm:$0xff]  ;;  %1393 = vmatpush.msrb.mxu2 %v1180_v57 }
  0xd8   : > { %1413 = vmatpush.msrb.mxu3 %v1244_v58  ;;  %v1036_v59 = vld [vmem:[%s2668_s14 + $0x900] sm:$0xff] }
  0xd9   : > { %v1100_v60 = vld [vmem:[%s2668_s14 + $0xb00] sm:$0xff]  ;;  %1357 = vmatpush.msrb.mxu0 %v1036_v59 }
  0xda   : > { %v1176_v61 = vld [vmem:[%s2668_s14 + $0xd60] sm:$0xff]  ;;  %1377 = vmatpush.msrb.mxu1 %v1100_v60 }
  0xdb   : > { %v1240_v62 = vld [vmem:[%s2668_s14 + $0xf60] sm:$0xff]  ;;  %1394 = vmatpush.msrb.mxu2 %v1176_v61 }
  0xdc   : > { %1414 = vmatpush.msrb.mxu3 %v1240_v62  ;;  %v1032_v63 = vld [vmem:[%s2668_s14 + $0x8e0] sm:$0xff] }
  0xdd   : > { %v1096_v0 = vld [vmem:[%s2668_s14 + $0xae0] sm:$0xff]  ;;  %1358 = vmatpush.msrb.mxu0 %v1032_v63 }
  0xde   : > { %v1172_v1 = vld [vmem:[%s2668_s14 + $0xd40] sm:$0xff]  ;;  %1378 = vmatpush.msrb.mxu1 %v1096_v0 }
  0xdf   : > { %v1236_v2 = vld [vmem:[%s2668_s14 + $0xf40] sm:$0xff]  ;;  %1395 = vmatpush.msrb.mxu2 %v1172_v1 }
  0xe0   : > { %1415 = vmatpush.msrb.mxu3 %v1236_v2  ;;  %v1028_v3 = vld [vmem:[%s2668_s14 + $0x8c0] sm:$0xff] }
  0xe1   : > { %v1092_v4 = vld [vmem:[%s2668_s14 + $0xac0] sm:$0xff]  ;;  %1359 = vmatpush.msrb.mxu0 %v1028_v3 }
  0xe2   : > { %v1168_v5 = vld [vmem:[%s2668_s14 + $0xd20] sm:$0xff]  ;;  %1379 = vmatpush.msrb.mxu1 %v1092_v4 }
  0xe3   : > { %v1232_v6 = vld [vmem:[%s2668_s14 + $0xf20] sm:$0xff]  ;;  %1396 = vmatpush.msrb.mxu2 %v1168_v5 }
  0xe4   : > { %1416 = vmatpush.msrb.mxu3 %v1232_v6  ;;  %v1024_v7 = vld [vmem:[%s2668_s14 + $0x8a0] sm:$0xff] }
  0xe5   : > { %v1088_v8 = vld [vmem:[%s2668_s14 + $0xaa0] sm:$0xff]  ;;  %1360 = vmatpush.msrb.mxu0 %v1024_v7 }
  0xe6   : > { %v1164_v9 = vld [vmem:[%s2668_s14 + $0xd00] sm:$0xff]  ;;  %1380 = vmatpush.msrb.mxu1 %v1088_v8  ;;  %v445_v8 = vperm.slane %v2871_v31, 4 }
  0xe7   : > { %v1228_v10 = vld [vmem:[%s2668_s14 + $0xf00] sm:$0xff]  ;;  %1397 = vmatpush.msrb.mxu2 %v1164_v9 }
  0xe8   : > { %1417 = vmatpush.msrb.mxu3 %v1228_v10  ;;  %v1020_v11 = vld [vmem:[%s2668_s14 + $0x880] sm:$0xff]  ;;  %v446_v10 = vperm.slane %v2871_v31, 5 }
  0xe9   : > { %v1084_v12 = vld [vmem:[%s2668_s14 + $0xa80] sm:$0xff]  ;;  %1361 = vmatpush.msrb.mxu0 %v1020_v11 }
  0xea   : > { %v1160_v13 = vld [vmem:[%s2668_s14 + $0xce0] sm:$0xff]  ;;  %1381 = vmatpush.msrb.mxu1 %v1084_v12 }
  0xeb   : > { %v1224_v14 = vld [vmem:[%s2668_s14 + $0xee0] sm:$0xff]  ;;  %1398 = vmatpush.msrb.mxu2 %v1160_v13 }
  0xec   : > { %1418 = vmatpush.msrb.mxu3 %v1224_v14  ;;  %v1016_v15 = vld [vmem:[%s2668_s14 + $0x860] sm:$0xff] }
  0xed   : > { %v1080_v16 = vld [vmem:[%s2668_s14 + $0xa60] sm:$0xff]  ;;  %1362 = vmatpush.msrb.mxu0 %v1016_v15 }
  0xee   : > { %v1156_v17 = vld [vmem:[%s2668_s14 + $0xcc0] sm:$0xff]  ;;  %1382 = vmatpush.msrb.mxu1 %v1080_v16 }
  0xef   : > { %v1220_v18 = vld [vmem:[%s2668_s14 + $0xec0] sm:$0xff]  ;;  %1399 = vmatpush.msrb.mxu2 %v1156_v17 }
  0xf0   : > { %1419 = vmatpush.msrb.mxu3 %v1220_v18  ;;  %v1012_v19 = vld [vmem:[%s2668_s14 + $0x840] sm:$0xff] }
  0xf1   : > { %v1076_v20 = vld [vmem:[%s2668_s14 + $0xa40] sm:$0xff]  ;;  %1363 = vmatpush.msrb.mxu0 %v1012_v19 }
  0xf2   : > { %v1152_v21 = vld [vmem:[%s2668_s14 + $0xca0] sm:$0xff]  ;;  %1383 = vmatpush.msrb.mxu1 %v1076_v20 }
  0xf3   : > { %v1216_v22 = vld [vmem:[%s2668_s14 + $0xea0] sm:$0xff]  ;;  %1400 = vmatpush.msrb.mxu2 %v1152_v21 }
  0xf4   : > { %1420 = vmatpush.msrb.mxu3 %v1216_v22  ;;  %v1008_v23 = vld [vmem:[%s2668_s14 + $0x820] sm:$0xff] }
  0xf5   : > { %v1072_v24 = vld [vmem:[%s2668_s14 + $0xa20] sm:$0xff]  ;;  %1364 = vmatpush.msrb.mxu0 %v1008_v23 }
  0xf6   : > { %v1148_v25 = vld [vmem:[%s2668_s14 + $0xc80] sm:$0xff]  ;;  %1384 = vmatpush.msrb.mxu1 %v1072_v24 }
  0xf7   : > { %v1212_v26 = vld [vmem:[%s2668_s14 + $0xe80] sm:$0xff]  ;;  %1401 = vmatpush.msrb.mxu2 %v1148_v25  ;;  %v2879_v40 = vpop.permute.xlu0 %668 }
  0xf8   : > { %1421 = vmatpush.msrb.mxu3 %v1212_v26  ;;  %v1004_v27 = vld [vmem:[%s2668_s14 + $0x800] sm:$0xff] }
  0xf9   : > { %v1068_v28 = vld [vmem:[%s2668_s14 + $0xa00] sm:$0xff]  ;;  %1365 = vmatpush.msrb.mxu0 %v1004_v27 }
  0xfa   : > { %v1144_v29 = vld [vmem:[%s2668_s14 + $0xc60] sm:$0xff]  ;;  %1385 = vmatpush.msrb.mxu1 %v1068_v28  ;;  %v447_v28 = vperm.slane %v2871_v31, 6 }
  0xfb   : > { %v1208_v30 = vld [vmem:[%s2668_s14 + $0xe60] sm:$0xff]  ;;  %1402 = vmatpush.msrb.mxu2 %v1144_v29  ;;  %v448_v29 = vperm.slane %v2871_v31, 7 }
  0xfc   : > { %1422 = vmatpush.msrb.mxu3 %v1208_v30  ;;  %v1140_v32 = vld [vmem:[%s2668_s14 + $0xc40] sm:$0xff]  ;;  %v481_v34 = vpop.f32.mrf.mxu0 }
  0xfd   : > { %v1204_v33 = vld [vmem:[%s2668_s14 + $0xe40] sm:$0xff]  ;;  %v504_v35 = vpop.f32.mrf.mxu1  ;;  %1403 = vmatpush.msrb.mxu2 %v1140_v32  ;;  %v482_v43 = vadd.f32 %v481_v34, %v441_v38 }
  0xfe   : > { %1423 = vmatpush.msrb.mxu3 %v1204_v33  ;;  %v1136_v36 = vld [vmem:[%s2668_s14 + $0xc20] sm:$0xff]  ;;  %v505_v44 = vadd.f32 %v504_v35, %v442_v39 }
  0xff   : > { %v1200_v37 = vld [vmem:[%s2668_s14 + $0xe20] sm:$0xff]  ;;  %1404 = vmatpush.msrb.mxu2 %v1136_v36  ;;  %v648_v51 = vmax.f32 %v482_v43, 0.0  ;;  %v2885_v59 = vpop.permute.xlu0 %673 }
 0x100   : > { %1424 = vmatpush.msrb.mxu3 %v1200_v37  ;;  %v1132_v41 = vld [vmem:[%s2668_s14 + $0xc00] sm:$0xff]  ;;  %v649_v52 = vmax.f32 %v505_v44, 0.0 }
 0x101   : > { %v1196_v42 = vld [vmem:[%s2668_s14 + $0xe00] sm:$0xff]  ;;  %1405 = vmatpush.msrb.mxu2 %v1132_v41  ;;  %v676_v60 = vmul.f32 %v2879_v40, %v648_v51 }
 0x102   : > { %1425 = vmatpush.msrb.mxu3 %v1196_v42  ;;  %v677_v62 = vmul.f32 %v2879_v40, %v649_v52 }
 0x103   : > { %v527_v46 = vpop.f32.mrf.mxu2 }
 0x104   : > { %v550_v48 = vpop.f32.mrf.mxu3  ;;  %v484_v49 = vpop.f32.mrf.mxu0  ;;  %v528_v55 = vadd.f32 %v527_v46, %v443_v45 }
 0x105   : > { %v507_v50 = vpop.f32.mrf.mxu1  ;;  %v485_v53 = vadd.f32 %v484_v49, %v441_v38  ;;  %v551_v56 = vadd.f32 %v550_v48, %v444_v47 }
 0x106   : > { %v508_v54 = vadd.f32 %v507_v50, %v442_v39  ;;  %v650_v0 = vmax.f32 %v528_v55, 0.0 }
 0x107   : > { %v656_v57 = vmax.f32 %v485_v53, 0.0  ;;  %v651_v1 = vmax.f32 %v551_v56, 0.0  ;;  %v809_v53 = vld [vmem:[%s2668_s14 + $0x1e8] sm:$0xff] }
 0x108   : > { %v657_v58 = vmax.f32 %v508_v54, 0.0  ;;  %v678_v16 = vmul.f32 %v2879_v40, %v650_v0  ;;  %v873_v54 = vld [vmem:[%s2668_s14 + $0x3e8] sm:$0xff] }
 0x109   : > { %v684_v61 = vmul.f32 %v2885_v59, %v656_v57  ;;  %v679_v17 = vmul.f32 %v2879_v40, %v651_v1 }
 0x10a   : > { %v685_v63 = vmul.f32 %v2885_v59, %v657_v58 }
 0x10b   : > { %v530_v2 = vpop.f32.mrf.mxu2  ;;  %v692_v4 = vadd.f32 %v684_v61, %v676_v60 }
 0x10c   : > { %v553_v3 = vpop.f32.mrf.mxu3  ;;  %v699_v5 = vadd.f32 %v685_v63, %v677_v62  ;;  %v531_v6 = vadd.f32 %v530_v2, %v443_v45  ;;  %v573_v9 = vpop.f32.mrf.mxu0  ;;  %v805_v62 = vld [vmem:[%s2668_s14 + $0x1c8] sm:$0xff] }
 0x10d   : > { %v554_v7 = vadd.f32 %v553_v3, %v444_v47  ;;  %v596_v11 = vpop.f32.mrf.mxu1  ;;  %v693_v12 = vrot.slane %v692_v4, 4  ;;  %v574_v22 = vadd.f32 %v573_v9, %v445_v8  ;;  %v869_v63 = vld [vmem:[%s2668_s14 + $0x3c8] sm:$0xff] }
 0x10e   : > { %v700_v13 = vrot.slane %v699_v5, 4  ;;  %v658_v14 = vmax.f32 %v531_v6, 0.0  ;;  %v597_v23 = vadd.f32 %v596_v11, %v446_v10  ;;  %v865_v9 = vld [vmem:[%s2668_s14 + $0x3a8] sm:$0xff] }
 0x10f   : > { %v659_v15 = vmax.f32 %v554_v7, 0.0  ;;  %v694_v18 = vadd.f32 %v693_v12, %v692_v4  ;;  %v652_v37 = vmax.f32 %v574_v22, 0.0 }
 0x110   : > { %v701_v19 = vadd.f32 %v700_v13, %v699_v5  ;;  %v686_v20 = vmul.f32 %v2885_v59, %v658_v14  ;;  %v653_v38 = vmax.f32 %v597_v23, 0.0 }
 0x111   : > { %v687_v21 = vmul.f32 %v2885_v59, %v659_v15  ;;  %v695_v24 = vrot.slane %v694_v18, 2  ;;  %v680_v57 = vmul.f32 %v2879_v40, %v652_v37 }
 0x112   : > { %v702_v25 = vrot.slane %v701_v19, 2  ;;  %v706_v26 = vadd.f32 %v686_v20, %v678_v16  ;;  %v681_v58 = vmul.f32 %v2879_v40, %v653_v38  ;;  %v797_v20 = vld [vmem:[%s2668_s14 + $0x188] sm:$0xff] }
 0x113   : > { %v713_v27 = vadd.f32 %v687_v21, %v679_v17  ;;  %v619_v30 = vpop.f32.mrf.mxu2  ;;  %v696_v33 = vadd.f32 %v695_v24, %v694_v18  ;;  %v861_v21 = vld [vmem:[%s2668_s14 + $0x388] sm:$0xff] }
 0x114   : > { %v642_v32 = vpop.f32.mrf.mxu3  ;;  %v703_v34 = vadd.f32 %v702_v25, %v701_v19  ;;  %v707_v35 = vrot.slane %v706_v26, 4  ;;  %v576_v39 = vpop.f32.mrf.mxu0  ;;  %v620_v48 = vadd.f32 %v619_v30, %v447_v28  ;;  %v937_v25 = vld [vmem:[%s2668_s14 + $0x5e8] sm:$0xff] }
 0x115   : > { %v714_v36 = vrot.slane %v713_v27, 4  ;;  %v599_v41 = vpop.f32.mrf.mxu1  ;;  %v577_v42 = vadd.f32 %v576_v39, %v445_v8  ;;  %v697_v44 = vrot.slane %v696_v33, 1  ;;  %v643_v31 = vadd.f32 %v642_v32, %v448_v29  ;;  %v801_v8 = vld [vmem:[%s2668_s14 + $0x1a8] sm:$0xff] }
 0x116   : > { %v600_v43 = vadd.f32 %v599_v41, %v446_v10  ;;  %v704_v45 = vrot.slane %v703_v34, 1  ;;  %v708_v46 = vadd.f32 %v707_v35, %v706_v26  ;;  %v654_v2 = vmax.f32 %v620_v48, 0.0  ;;  %v1001_v26 = vld [vmem:[%s2668_s14 + $0x7e8] sm:$0xff] }
 0x117   : > { %v715_v47 = vadd.f32 %v714_v36, %v713_v27  ;;  %v660_v49 = vmax.f32 %v577_v42, 0.0  ;;  %v2899_v51 = vadd.f32 %v697_v44, %v696_v33  ;;  %v655_v3 = vmax.f32 %v643_v31, 0.0  ;;  %v793_v30 = vld [vmem:[%s2668_s14 + $0x168] sm:$0xff] }
 0x118   : > { %v661_v50 = vmax.f32 %v600_v43, 0.0  ;;  %v2901_v52 = vadd.f32 %v704_v45, %v703_v34  ;;  %v709_v55 = vrot.slane %v708_v46, 2  ;;  %v682_v22 = vmul.f32 %v2879_v40, %v654_v2  ;;  %v857_v32 = vld [vmem:[%s2668_s14 + $0x368] sm:$0xff] }
 0x119   : > { %v716_v56 = vrot.slane %v715_v47, 2  ;;  %v688_v60 = vmul.f32 %v2885_v59, %v660_v49  ;;  %1286 = vmatmul.f32.vlgmr.msra.gmra.mxu0 %v2899_v51  ;;  %v683_v27 = vmul.f32 %v2879_v40, %v655_v3  ;;  %v933_v35 = vld [vmem:[%s2668_s14 + $0x5c8] sm:$0xff] }
 0x11a   : > { %v689_v61 = vmul.f32 %v2885_v59, %v661_v50  ;;  %1306 = vmatmul.f32.vlgmr.msra.gmra.mxu1 %v2901_v52  ;;  %v710_v0 = vadd.f32 %v709_v55, %v708_v46  ;;  %1430 = vmatpush.msra.mxu0 %v809_v53  ;;  %v997_v40 = vld [vmem:[%s2668_s14 + $0x7c8] sm:$0xff] }
 0x11b   : > { %v717_v1 = vadd.f32 %v716_v56, %v715_v47  ;;  %1450 = vmatpush.msra.mxu1 %v873_v54  ;;  %v720_v4 = vadd.f32 %v688_v60, %v680_v57  ;;  %v622_v6 = vpop.f32.mrf.mxu2  ;;  %v853_v38 = vld [vmem:[%s2668_s14 + $0x348] sm:$0xff] }
 0x11c   : > { %v727_v5 = vadd.f32 %v689_v61, %v681_v58  ;;  %v645_v7 = vpop.f32.mrf.mxu3  ;;  %v623_v10 = vadd.f32 %v622_v6, %v447_v28  ;;  %1431 = vmatpush.msra.mxu0 %v805_v62  ;;  %v711_v12 = vrot.slane %v710_v0, 1  ;;  %v929_v42 = vld [vmem:[%s2668_s14 + $0x5a8] sm:$0xff] }
 0x11d   : > { %v646_v11 = vadd.f32 %v645_v7, %v448_v29  ;;  %1451 = vmatpush.msra.mxu1 %v869_v63  ;;  %v718_v13 = vrot.slane %v717_v1, 1  ;;  %v721_v14 = vrot.slane %v720_v4, 4  ;;  %v993_v43 = vld [vmem:[%s2668_s14 + $0x7a8] sm:$0xff] }
 0x11e   : > { %v728_v15 = vrot.slane %v727_v5, 4  ;;  %v662_v16 = vmax.f32 %v623_v10, 0.0  ;;  %1432 = vmatpush.msra.mxu0 %v801_v8  ;;  %v2915_v18 = vadd.f32 %v711_v12, %v710_v0  ;;  %v785_v46 = vld [vmem:[%s2668_s14 + $0x128] sm:$0xff] }
 0x11f   : > { %v663_v17 = vmax.f32 %v646_v11, 0.0  ;;  %1452 = vmatpush.msra.mxu1 %v865_v9  ;;  %v2917_v19 = vadd.f32 %v718_v13, %v717_v1  ;;  %v722_v23 = vadd.f32 %v721_v14, %v720_v4  ;;  %v849_v47 = vld [vmem:[%s2668_s14 + $0x328] sm:$0xff] }
 0x120   : > { %v729_v24 = vadd.f32 %v728_v15, %v727_v5  ;;  %v690_v28 = vmul.f32 %v2885_v59, %v662_v16  ;;  %1326 = vmatmul.f32.vlgmr.msra.gmra.mxu2 %v2915_v18  ;;  %1433 = vmatpush.msra.mxu0 %v797_v20  ;;  %v925_v48 = vld [vmem:[%s2668_s14 + $0x588] sm:$0xff] }
 0x121   : > { %v691_v29 = vmul.f32 %v2885_v59, %v663_v17  ;;  %1346 = vmatmul.f32.vlgmr.msra.gmra.mxu3 %v2917_v19  ;;  %v723_v33 = vrot.slane %v722_v23, 2  ;;  %1453 = vmatpush.msra.mxu1 %v861_v21  ;;  %v789_v59 = vld [vmem:[%s2668_s14 + $0x148] sm:$0xff] }
 0x122   : > { %v730_v34 = vrot.slane %v729_v24, 2  ;;  %v734_v36 = vadd.f32 %v690_v28, %v682_v22  ;;  %1470 = vmatpush.msra.mxu2 %v937_v25  ;;  %1490 = vmatpush.msra.mxu3 %v1001_v26  ;;  %v989_v31 = vld [vmem:[%s2668_s14 + $0x788] sm:$0xff] }
 0x123   : > { %v741_v37 = vadd.f32 %v691_v29, %v683_v27  ;;  %v724_v39 = vadd.f32 %v723_v33, %v722_v23  ;;  %1434 = vmatpush.msra.mxu0 %v793_v30  ;;  %1454 = vmatpush.msra.mxu1 %v857_v32  ;;  %v781_v55 = vld [vmem:[%s2668_s14 + $0x108] sm:$0xff] }
 0x124   : > { %v731_v41 = vadd.f32 %v730_v34, %v729_v24  ;;  %v735_v44 = vrot.slane %v734_v36, 4  ;;  %1471 = vmatpush.msra.mxu2 %v933_v35  ;;  %1491 = vmatpush.msra.mxu3 %v997_v40  ;;  %v845_v56 = vld [vmem:[%s2668_s14 + $0x308] sm:$0xff] }
 0x125   : > { %v742_v45 = vrot.slane %v741_v37, 4  ;;  %1435 = vmatpush.msra.mxu0 %v789_v59  ;;  %1455 = vmatpush.msra.mxu1 %v853_v38  ;;  %v725_v49 = vrot.slane %v724_v39, 1  ;;  %v921_v57 = vld [vmem:[%s2668_s14 + $0x568] sm:$0xff] }
 0x126   : > { %v732_v50 = vrot.slane %v731_v41, 1  ;;  %v736_v53 = vadd.f32 %v735_v44, %v734_v36  ;;  %1472 = vmatpush.msra.mxu2 %v929_v42  ;;  %1492 = vmatpush.msra.mxu3 %v993_v43  ;;  %v985_v58 = vld [vmem:[%s2668_s14 + $0x768] sm:$0xff] }
 0x127   : > { %v743_v54 = vadd.f32 %v742_v45, %v741_v37  ;;  %1436 = vmatpush.msra.mxu0 %v785_v46  ;;  %1456 = vmatpush.msra.mxu1 %v849_v47  ;;  %v2945_v60 = vadd.f32 %v725_v49, %v724_v39  ;;  %v777_v0 = vld [vmem:[%s2668_s14 + $0xe8] sm:$0xff] }
 0x128   : > { %v2947_v61 = vadd.f32 %v732_v50, %v731_v41  ;;  %v737_v62 = vrot.slane %v736_v53, 2  ;;  %1473 = vmatpush.msra.mxu2 %v925_v48  ;;  %1493 = vmatpush.msra.mxu3 %v989_v31  ;;  %v841_v1 = vld [vmem:[%s2668_s14 + $0x2e8] sm:$0xff] }
 0x129   : > { %v744_v63 = vrot.slane %v743_v54, 2  ;;  %1437 = vmatpush.msra.mxu0 %v781_v55  ;;  %1457 = vmatpush.msra.mxu1 %v845_v56  ;;  %v917_v4 = vld [vmem:[%s2668_s14 + $0x548] sm:$0xff] }
 0x12a   : > { %v738_v2 = vadd.f32 %v737_v62, %v736_v53  ;;  %1474 = vmatpush.msra.mxu2 %v921_v57  ;;  %1494 = vmatpush.msra.mxu3 %v985_v58  ;;  %v981_v5 = vld [vmem:[%s2668_s14 + $0x748] sm:$0xff] }
 0x12b   : > { %v745_v3 = vadd.f32 %v744_v63, %v743_v54  ;;  %1366 = vmatmul.f32.vlgmr.msrb.gmra.mxu0 %v2945_v60  ;;  %1386 = vmatmul.f32.vlgmr.msrb.gmra.mxu1 %v2947_v61  ;;  %v773_v6 = vld [vmem:[%s2668_s14 + $0xc8] sm:$0xff] }
 0x12c   : > { %v837_v7 = vld [vmem:[%s2668_s14 + $0x2c8] sm:$0xff]  ;;  %1438 = vmatpush.msra.mxu0 %v777_v0  ;;  %1458 = vmatpush.msra.mxu1 %v841_v1  ;;  %v739_v10 = vrot.slane %v738_v2, 1 }
 0x12d   : > { %v913_v8 = vld [vmem:[%s2668_s14 + $0x528] sm:$0xff]  ;;  %v746_v11 = vrot.slane %v745_v3, 1  ;;  %1475 = vmatpush.msra.mxu2 %v917_v4  ;;  %1495 = vmatpush.msra.mxu3 %v981_v5 }
 0x12e   : > { %v977_v9 = vld [vmem:[%s2668_s14 + $0x728] sm:$0xff]  ;;  %1439 = vmatpush.msra.mxu0 %v773_v6  ;;  %1459 = vmatpush.msra.mxu1 %v837_v7  ;;  %v2963_v16 = vadd.f32 %v739_v10, %v738_v2 }
 0x12f   : > { %v769_v12 = vld [vmem:[%s2668_s14 + $0xa8] sm:$0xff]  ;;  %v2965_v17 = vadd.f32 %v746_v11, %v745_v3  ;;  %1476 = vmatpush.msra.mxu2 %v913_v8  ;;  %1496 = vmatpush.msra.mxu3 %v977_v9 }
 0x130   : > { %v833_v13 = vld [vmem:[%s2668_s14 + $0x2a8] sm:$0xff]  ;;  %1440 = vmatpush.msra.mxu0 %v769_v12  ;;  %1406 = vmatmul.f32.vlgmr.msrb.gmra.mxu2 %v2963_v16 }
 0x131   : > { %v909_v14 = vld [vmem:[%s2668_s14 + $0x508] sm:$0xff]  ;;  %1460 = vmatpush.msra.mxu1 %v833_v13  ;;  %1426 = vmatmul.f32.vlgmr.msrb.gmra.mxu3 %v2965_v17 }
 0x132   : > { %v973_v15 = vld [vmem:[%s2668_s14 + $0x708] sm:$0xff]  ;;  %1477 = vmatpush.msra.mxu2 %v909_v14 }
 0x133   : > { %v765_v20 = vld [vmem:[%s2668_s14 + $0x88] sm:$0xff]  ;;  %1497 = vmatpush.msra.mxu3 %v973_v15 }
 0x134   : > { %v829_v21 = vld [vmem:[%s2668_s14 + $0x288] sm:$0xff]  ;;  %1441 = vmatpush.msra.mxu0 %v765_v20 }
 0x135   : > { %v905_v22 = vld [vmem:[%s2668_s14 + $0x4e8] sm:$0xff]  ;;  %1461 = vmatpush.msra.mxu1 %v829_v21 }
 0x136   : > { %v969_v23 = vld [vmem:[%s2668_s14 + $0x6e8] sm:$0xff]  ;;  %1478 = vmatpush.msra.mxu2 %v905_v22 }
 0x137   : > { %v761_v24 = vld [vmem:[%s2668_s14 + $0x68] sm:$0xff]  ;;  %1498 = vmatpush.msra.mxu3 %v969_v23 }
 0x138   : > { %v825_v25 = vld [vmem:[%s2668_s14 + $0x268] sm:$0xff]  ;;  %1442 = vmatpush.msra.mxu0 %v761_v24 }
 0x139   : > { %v901_v26 = vld [vmem:[%s2668_s14 + $0x4c8] sm:$0xff]  ;;  %1462 = vmatpush.msra.mxu1 %v825_v25 }
 0x13a   : > { %v965_v27 = vld [vmem:[%s2668_s14 + $0x6c8] sm:$0xff]  ;;  %1479 = vmatpush.msra.mxu2 %v901_v26 }
 0x13b   : > { %v757_v28 = vld [vmem:[%s2668_s14 + $0x48] sm:$0xff]  ;;  %1499 = vmatpush.msra.mxu3 %v965_v27 }
 0x13c   : > { %v821_v29 = vld [vmem:[%s2668_s14 + $0x248] sm:$0xff]  ;;  %1443 = vmatpush.msra.mxu0 %v757_v28 }
 0x13d   : > { %v897_v30 = vld [vmem:[%s2668_s14 + $0x4a8] sm:$0xff]  ;;  %1463 = vmatpush.msra.mxu1 %v821_v29 }
 0x13e   : > { %v961_v32 = vld [vmem:[%s2668_s14 + $0x6a8] sm:$0xff]  ;;  %1480 = vmatpush.msra.mxu2 %v897_v30 }
 0x13f   : > { %v753_v33 = vld [vmem:[%s2668_s14 + $0x28] sm:$0xff]  ;;  %1500 = vmatpush.msra.mxu3 %v961_v32 }
 0x140   : > { %v817_v34 = vld [vmem:[%s2668_s14 + $0x228] sm:$0xff]  ;;  %1444 = vmatpush.msra.mxu0 %v753_v33 }
 0x141   : > { %v893_v35 = vld [vmem:[%s2668_s14 + $0x488] sm:$0xff]  ;;  %1464 = vmatpush.msra.mxu1 %v817_v34 }
 0x142   : > { %v957_v40 = vld [vmem:[%s2668_s14 + $0x688] sm:$0xff]  ;;  %1481 = vmatpush.msra.mxu2 %v893_v35 }
 0x143   : > { %v749_v36 = vld [vmem:[%s2668_s14 + $0x8] sm:$0xff]  ;;  %1501 = vmatpush.msra.mxu3 %v957_v40 }
 0x144   : > { %v813_v37 = vld [vmem:[%s2668_s14 + $0x208] sm:$0xff]  ;;  %1445 = vmatpush.msra.mxu0 %v749_v36 }
 0x145   : > { %v889_v59 = vld [vmem:[%s2668_s14 + $0x468] sm:$0xff]  ;;  %1465 = vmatpush.msra.mxu1 %v813_v37  ;;  %1446 = vmatmul.f32.vlgmr.msra.gmra.mxu0 %v2899_v51 }
 0x146   : > { %v953_v38 = vld [vmem:[%s2668_s14 + $0x668] sm:$0xff]  ;;  %1482 = vmatpush.msra.mxu2 %v889_v59  ;;  %1466 = vmatmul.f32.vlgmr.msra.gmra.mxu1 %v2901_v52 }
 0x147   : > { %v1065_v39 = vld [vmem:[%s2668_s14 + $0x9e8] sm:$0xff]  ;;  %1502 = vmatpush.msra.mxu3 %v953_v38 }
 0x148   : > { %v1129_v41 = vld [vmem:[%s2668_s14 + $0xbe8] sm:$0xff]  ;;  %1510 = vmatpush.msrb.mxu0 %v1065_v39 }
 0x149   : > { %v885_v42 = vld [vmem:[%s2668_s14 + $0x448] sm:$0xff]  ;;  %1530 = vmatpush.msrb.mxu1 %v1129_v41 }
 0x14a   : > { %v949_v43 = vld [vmem:[%s2668_s14 + $0x648] sm:$0xff]  ;;  %1483 = vmatpush.msra.mxu2 %v885_v42 }
 0x14b   : > { %v1061_v44 = vld [vmem:[%s2668_s14 + $0x9c8] sm:$0xff]  ;;  %1503 = vmatpush.msra.mxu3 %v949_v43 }
 0x14c   : > { %v1125_v45 = vld [vmem:[%s2668_s14 + $0xbc8] sm:$0xff]  ;;  %1511 = vmatpush.msrb.mxu0 %v1061_v44 }
 0x14d   : > { %v881_v46 = vld [vmem:[%s2668_s14 + $0x428] sm:$0xff]  ;;  %1531 = vmatpush.msrb.mxu1 %v1125_v45 }
 0x14e   : > { %v945_v47 = vld [vmem:[%s2668_s14 + $0x628] sm:$0xff]  ;;  %1484 = vmatpush.msra.mxu2 %v881_v46 }
 0x14f   : > { %v1057_v48 = vld [vmem:[%s2668_s14 + $0x9a8] sm:$0xff]  ;;  %1504 = vmatpush.msra.mxu3 %v945_v47 }
 0x150   : > { %v1121_v31 = vld [vmem:[%s2668_s14 + $0xba8] sm:$0xff]  ;;  %1512 = vmatpush.msrb.mxu0 %v1057_v48  ;;  %v810_v48 = vld [vmem:[%s2668_s14 + $0x1f0] sm:$0xff] }
 0x151   : > { %v877_v49 = vld [vmem:[%s2668_s14 + $0x408] sm:$0xff]  ;;  %1532 = vmatpush.msrb.mxu1 %v1121_v31  ;;  %v874_v31 = vld [vmem:[%s2668_s14 + $0x3f0] sm:$0xff] }
 0x152   : > { %v941_v50 = vld [vmem:[%s2668_s14 + $0x608] sm:$0xff]  ;;  %1485 = vmatpush.msra.mxu2 %v877_v49 }
 0x153   : > { %v1053_v53 = vld [vmem:[%s2668_s14 + $0x988] sm:$0xff]  ;;  %1505 = vmatpush.msra.mxu3 %v941_v50  ;;  %1486 = vmatmul.f32.vlgmr.msra.gmra.mxu2 %v2915_v18 }
 0x154   : > { %v1117_v54 = vld [vmem:[%s2668_s14 + $0xb88] sm:$0xff]  ;;  %1506 = vmatmul.f32.vlgmr.msra.gmra.mxu3 %v2917_v19  ;;  %1513 = vmatpush.msrb.mxu0 %v1053_v53  ;;  %v806_v53 = vld [vmem:[%s2668_s14 + $0x1d0] sm:$0xff] }
 0x155   : > { %v1193_v55 = vld [vmem:[%s2668_s14 + $0xde8] sm:$0xff]  ;;  %1533 = vmatpush.msrb.mxu1 %v1117_v54  ;;  %v870_v54 = vld [vmem:[%s2668_s14 + $0x3d0] sm:$0xff] }
 0x156   : > { %v1257_v56 = vld [vmem:[%s2668_s14 + $0xfe8] sm:$0xff]  ;;  %1550 = vmatpush.msrb.mxu2 %v1193_v55 }
 0x157   : > { %v1049_v57 = vld [vmem:[%s2668_s14 + $0x968] sm:$0xff]  ;;  %1570 = vmatpush.msrb.mxu3 %v1257_v56 }
 0x158   : > { %v1113_v58 = vld [vmem:[%s2668_s14 + $0xb68] sm:$0xff]  ;;  %1514 = vmatpush.msrb.mxu0 %v1049_v57  ;;  %v802_v57 = vld [vmem:[%s2668_s14 + $0x1b0] sm:$0xff] }
 0x159   : > { %v1189_v62 = vld [vmem:[%s2668_s14 + $0xdc8] sm:$0xff]  ;;  %1534 = vmatpush.msrb.mxu1 %v1113_v58  ;;  %v866_v58 = vld [vmem:[%s2668_s14 + $0x3b0] sm:$0xff] }
 0x15a   : > { %v1253_v63 = vld [vmem:[%s2668_s14 + $0xfc8] sm:$0xff]  ;;  %1551 = vmatpush.msrb.mxu2 %v1189_v62 }
 0x15b   : > { %v1045_v0 = vld [vmem:[%s2668_s14 + $0x948] sm:$0xff]  ;;  %1571 = vmatpush.msrb.mxu3 %v1253_v63 }
 0x15c   : > { %v1109_v1 = vld [vmem:[%s2668_s14 + $0xb48] sm:$0xff]  ;;  %1515 = vmatpush.msrb.mxu0 %v1045_v0  ;;  %v798_v0 = vld [vmem:[%s2668_s14 + $0x190] sm:$0xff] }
 0x15d   : > { %v1185_v2 = vld [vmem:[%s2668_s14 + $0xda8] sm:$0xff]  ;;  %1535 = vmatpush.msrb.mxu1 %v1109_v1  ;;  %v862_v1 = vld [vmem:[%s2668_s14 + $0x390] sm:$0xff] }
 0x15e   : > { %v1249_v3 = vld [vmem:[%s2668_s14 + $0xfa8] sm:$0xff]  ;;  %1552 = vmatpush.msrb.mxu2 %v1185_v2  ;;  %v938_v2 = vld [vmem:[%s2668_s14 + $0x5f0] sm:$0xff] }
 0x15f   : > { %v1041_v4 = vld [vmem:[%s2668_s14 + $0x928] sm:$0xff]  ;;  %1572 = vmatpush.msrb.mxu3 %v1249_v3  ;;  %v1002_v3 = vld [vmem:[%s2668_s14 + $0x7f0] sm:$0xff] }
 0x160   : > { %v1105_v5 = vld [vmem:[%s2668_s14 + $0xb28] sm:$0xff]  ;;  %1516 = vmatpush.msrb.mxu0 %v1041_v4  ;;  %v794_v4 = vld [vmem:[%s2668_s14 + $0x170] sm:$0xff] }
 0x161   : > { %v1181_v6 = vld [vmem:[%s2668_s14 + $0xd88] sm:$0xff]  ;;  %1536 = vmatpush.msrb.mxu1 %v1105_v5  ;;  %v858_v5 = vld [vmem:[%s2668_s14 + $0x370] sm:$0xff] }
 0x162   : > { %v1245_v7 = vld [vmem:[%s2668_s14 + $0xf88] sm:$0xff]  ;;  %1553 = vmatpush.msrb.mxu2 %v1181_v6  ;;  %v934_v6 = vld [vmem:[%s2668_s14 + $0x5d0] sm:$0xff] }
 0x163   : > { %v1037_v8 = vld [vmem:[%s2668_s14 + $0x908] sm:$0xff]  ;;  %1573 = vmatpush.msrb.mxu3 %v1245_v7  ;;  %v998_v7 = vld [vmem:[%s2668_s14 + $0x7d0] sm:$0xff] }
 0x164   : > { %v1101_v9 = vld [vmem:[%s2668_s14 + $0xb08] sm:$0xff]  ;;  %1517 = vmatpush.msrb.mxu0 %v1037_v8  ;;  %v790_v8 = vld [vmem:[%s2668_s14 + $0x150] sm:$0xff] }
 0x165   : > { %v1177_v10 = vld [vmem:[%s2668_s14 + $0xd68] sm:$0xff]  ;;  %1537 = vmatpush.msrb.mxu1 %v1101_v9  ;;  %v854_v9 = vld [vmem:[%s2668_s14 + $0x350] sm:$0xff] }
 0x166   : > { %v1241_v11 = vld [vmem:[%s2668_s14 + $0xf68] sm:$0xff]  ;;  %1554 = vmatpush.msrb.mxu2 %v1177_v10  ;;  %v930_v10 = vld [vmem:[%s2668_s14 + $0x5b0] sm:$0xff] }
 0x167   : > { %v1033_v12 = vld [vmem:[%s2668_s14 + $0x8e8] sm:$0xff]  ;;  %1574 = vmatpush.msrb.mxu3 %v1241_v11  ;;  %v994_v11 = vld [vmem:[%s2668_s14 + $0x7b0] sm:$0xff] }
 0x168   : > { %v1097_v13 = vld [vmem:[%s2668_s14 + $0xae8] sm:$0xff]  ;;  %1518 = vmatpush.msrb.mxu0 %v1033_v12  ;;  %v786_v12 = vld [vmem:[%s2668_s14 + $0x130] sm:$0xff] }
 0x169   : > { %v1173_v14 = vld [vmem:[%s2668_s14 + $0xd48] sm:$0xff]  ;;  %1538 = vmatpush.msrb.mxu1 %v1097_v13  ;;  %v850_v13 = vld [vmem:[%s2668_s14 + $0x330] sm:$0xff] }
 0x16a   : > { %v1237_v15 = vld [vmem:[%s2668_s14 + $0xf48] sm:$0xff]  ;;  %1555 = vmatpush.msrb.mxu2 %v1173_v14  ;;  %v926_v14 = vld [vmem:[%s2668_s14 + $0x590] sm:$0xff] }
 0x16b   : > { %v1029_v20 = vld [vmem:[%s2668_s14 + $0x8c8] sm:$0xff]  ;;  %1575 = vmatpush.msrb.mxu3 %v1237_v15  ;;  %v990_v15 = vld [vmem:[%s2668_s14 + $0x790] sm:$0xff] }
 0x16c   : > { %v1093_v21 = vld [vmem:[%s2668_s14 + $0xac8] sm:$0xff]  ;;  %1519 = vmatpush.msrb.mxu0 %v1029_v20  ;;  %v782_v20 = vld [vmem:[%s2668_s14 + $0x110] sm:$0xff] }
 0x16d   : > { %v1169_v22 = vld [vmem:[%s2668_s14 + $0xd28] sm:$0xff]  ;;  %1539 = vmatpush.msrb.mxu1 %v1093_v21  ;;  %v846_v21 = vld [vmem:[%s2668_s14 + $0x310] sm:$0xff] }
 0x16e   : > { %v1233_v23 = vld [vmem:[%s2668_s14 + $0xf28] sm:$0xff]  ;;  %1556 = vmatpush.msrb.mxu2 %v1169_v22  ;;  %v922_v22 = vld [vmem:[%s2668_s14 + $0x570] sm:$0xff] }
 0x16f   : > { %v1025_v24 = vld [vmem:[%s2668_s14 + $0x8a8] sm:$0xff]  ;;  %1576 = vmatpush.msrb.mxu3 %v1233_v23  ;;  %v986_v23 = vld [vmem:[%s2668_s14 + $0x770] sm:$0xff] }
 0x170   : > { %v1089_v25 = vld [vmem:[%s2668_s14 + $0xaa8] sm:$0xff]  ;;  %1520 = vmatpush.msrb.mxu0 %v1025_v24  ;;  %v778_v24 = vld [vmem:[%s2668_s14 + $0xf0] sm:$0xff] }
 0x171   : > { %v1165_v26 = vld [vmem:[%s2668_s14 + $0xd08] sm:$0xff]  ;;  %1540 = vmatpush.msrb.mxu1 %v1089_v25  ;;  %v842_v25 = vld [vmem:[%s2668_s14 + $0x2f0] sm:$0xff] }
 0x172   : > { %v1229_v27 = vld [vmem:[%s2668_s14 + $0xf08] sm:$0xff]  ;;  %1557 = vmatpush.msrb.mxu2 %v1165_v26  ;;  %v918_v26 = vld [vmem:[%s2668_s14 + $0x550] sm:$0xff] }
 0x173   : > { %v1021_v28 = vld [vmem:[%s2668_s14 + $0x888] sm:$0xff]  ;;  %1577 = vmatpush.msrb.mxu3 %v1229_v27  ;;  %v982_v27 = vld [vmem:[%s2668_s14 + $0x750] sm:$0xff] }
 0x174   : > { %v1085_v29 = vld [vmem:[%s2668_s14 + $0xa88] sm:$0xff]  ;;  %1521 = vmatpush.msrb.mxu0 %v1021_v28  ;;  %v774_v28 = vld [vmem:[%s2668_s14 + $0xd0] sm:$0xff] }
 0x175   : > { %v1161_v30 = vld [vmem:[%s2668_s14 + $0xce8] sm:$0xff]  ;;  %1541 = vmatpush.msrb.mxu1 %v1085_v29  ;;  %v838_v29 = vld [vmem:[%s2668_s14 + $0x2d0] sm:$0xff] }
 0x176   : > { %v1225_v32 = vld [vmem:[%s2668_s14 + $0xee8] sm:$0xff]  ;;  %1558 = vmatpush.msrb.mxu2 %v1161_v30  ;;  %v914_v30 = vld [vmem:[%s2668_s14 + $0x530] sm:$0xff] }
 0x177   : > { %v1017_v33 = vld [vmem:[%s2668_s14 + $0x868] sm:$0xff]  ;;  %1578 = vmatpush.msrb.mxu3 %v1225_v32  ;;  %v978_v32 = vld [vmem:[%s2668_s14 + $0x730] sm:$0xff] }
 0x178   : > { %v1081_v34 = vld [vmem:[%s2668_s14 + $0xa68] sm:$0xff]  ;;  %1522 = vmatpush.msrb.mxu0 %v1017_v33  ;;  %v770_v33 = vld [vmem:[%s2668_s14 + $0xb0] sm:$0xff] }
 0x179   : > { %v1157_v35 = vld [vmem:[%s2668_s14 + $0xcc8] sm:$0xff]  ;;  %1542 = vmatpush.msrb.mxu1 %v1081_v34  ;;  %v834_v34 = vld [vmem:[%s2668_s14 + $0x2b0] sm:$0xff] }
 0x17a   : > { %v1221_v40 = vld [vmem:[%s2668_s14 + $0xec8] sm:$0xff]  ;;  %1559 = vmatpush.msrb.mxu2 %v1157_v35  ;;  %v910_v35 = vld [vmem:[%s2668_s14 + $0x510] sm:$0xff] }
 0x17b   : > { %v1013_v36 = vld [vmem:[%s2668_s14 + $0x848] sm:$0xff]  ;;  %1579 = vmatpush.msrb.mxu3 %v1221_v40  ;;  %v974_v40 = vld [vmem:[%s2668_s14 + $0x710] sm:$0xff] }
 0x17c   : > { %v1077_v37 = vld [vmem:[%s2668_s14 + $0xa48] sm:$0xff]  ;;  %1523 = vmatpush.msrb.mxu0 %v1013_v36  ;;  %v766_v36 = vld [vmem:[%s2668_s14 + $0x90] sm:$0xff] }
 0x17d   : > { %v1153_v59 = vld [vmem:[%s2668_s14 + $0xca8] sm:$0xff]  ;;  %1543 = vmatpush.msrb.mxu1 %v1077_v37  ;;  %v830_v37 = vld [vmem:[%s2668_s14 + $0x290] sm:$0xff] }
 0x17e   : > { %v1217_v38 = vld [vmem:[%s2668_s14 + $0xea8] sm:$0xff]  ;;  %1560 = vmatpush.msrb.mxu2 %v1153_v59  ;;  %v906_v59 = vld [vmem:[%s2668_s14 + $0x4f0] sm:$0xff] }
 0x17f   : > { %v1009_v39 = vld [vmem:[%s2668_s14 + $0x828] sm:$0xff]  ;;  %1580 = vmatpush.msrb.mxu3 %v1217_v38  ;;  %v970_v38 = vld [vmem:[%s2668_s14 + $0x6f0] sm:$0xff] }
 0x180   : > { %v1073_v41 = vld [vmem:[%s2668_s14 + $0xa28] sm:$0xff]  ;;  %1524 = vmatpush.msrb.mxu0 %v1009_v39  ;;  %v762_v39 = vld [vmem:[%s2668_s14 + $0x70] sm:$0xff] }
 0x181   : > { %v1149_v42 = vld [vmem:[%s2668_s14 + $0xc88] sm:$0xff]  ;;  %1544 = vmatpush.msrb.mxu1 %v1073_v41  ;;  %v826_v41 = vld [vmem:[%s2668_s14 + $0x270] sm:$0xff] }
 0x182   : > { %v1213_v43 = vld [vmem:[%s2668_s14 + $0xe88] sm:$0xff]  ;;  %1561 = vmatpush.msrb.mxu2 %v1149_v42  ;;  %v902_v42 = vld [vmem:[%s2668_s14 + $0x4d0] sm:$0xff] }
 0x183   : > { %v1005_v44 = vld [vmem:[%s2668_s14 + $0x808] sm:$0xff]  ;;  %1581 = vmatpush.msrb.mxu3 %v1213_v43  ;;  %v966_v43 = vld [vmem:[%s2668_s14 + $0x6d0] sm:$0xff] }
 0x184   : > { %v1069_v45 = vld [vmem:[%s2668_s14 + $0xa08] sm:$0xff]  ;;  %1525 = vmatpush.msrb.mxu0 %v1005_v44  ;;  %v758_v44 = vld [vmem:[%s2668_s14 + $0x50] sm:$0xff] }
 0x185   : > { %v1145_v46 = vld [vmem:[%s2668_s14 + $0xc68] sm:$0xff]  ;;  %1545 = vmatpush.msrb.mxu1 %v1069_v45  ;;  %1526 = vmatmul.f32.vlgmr.msrb.gmra.mxu0 %v2945_v60  ;;  %v822_v45 = vld [vmem:[%s2668_s14 + $0x250] sm:$0xff] }
 0x186   : > { %v1209_v47 = vld [vmem:[%s2668_s14 + $0xe68] sm:$0xff]  ;;  %1562 = vmatpush.msrb.mxu2 %v1145_v46  ;;  %1546 = vmatmul.f32.vlgmr.msrb.gmra.mxu1 %v2947_v61  ;;  %v898_v46 = vld [vmem:[%s2668_s14 + $0x4b0] sm:$0xff] }
 0x187   : > { %1582 = vmatpush.msrb.mxu3 %v1209_v47  ;;  %v1141_v49 = vld [vmem:[%s2668_s14 + $0xc48] sm:$0xff]  ;;  %1590 = vmatpush.msra.mxu0 %v810_v48  ;;  %v962_v47 = vld [vmem:[%s2668_s14 + $0x6b0] sm:$0xff] }
 0x188   : > { %v1205_v50 = vld [vmem:[%s2668_s14 + $0xe48] sm:$0xff]  ;;  %1610 = vmatpush.msra.mxu1 %v874_v31  ;;  %1563 = vmatpush.msrb.mxu2 %v1141_v49  ;;  %v754_v48 = vld [vmem:[%s2668_s14 + $0x30] sm:$0xff] }
 0x189   : > { %v1137_v55 = vld [vmem:[%s2668_s14 + $0xc28] sm:$0xff]  ;;  %1583 = vmatpush.msrb.mxu3 %v1205_v50  ;;  %1591 = vmatpush.msra.mxu0 %v806_v53  ;;  %v818_v31 = vld [vmem:[%s2668_s14 + $0x230] sm:$0xff] }
 0x18a   : > { %v1201_v56 = vld [vmem:[%s2668_s14 + $0xe28] sm:$0xff]  ;;  %1611 = vmatpush.msra.mxu1 %v870_v54  ;;  %1564 = vmatpush.msrb.mxu2 %v1137_v55  ;;  %v894_v49 = vld [vmem:[%s2668_s14 + $0x490] sm:$0xff] }
 0x18b   : > { %v1133_v62 = vld [vmem:[%s2668_s14 + $0xc08] sm:$0xff]  ;;  %1584 = vmatpush.msrb.mxu3 %v1201_v56  ;;  %1592 = vmatpush.msra.mxu0 %v802_v57  ;;  %v958_v50 = vld [vmem:[%s2668_s14 + $0x690] sm:$0xff] }
 0x18c   : > { %v1197_v63 = vld [vmem:[%s2668_s14 + $0xe08] sm:$0xff]  ;;  %1612 = vmatpush.msra.mxu1 %v866_v58  ;;  %1565 = vmatpush.msrb.mxu2 %v1133_v62  ;;  %v750_v53 = vld [vmem:[%s2668_s14 + $0x10] sm:$0xff] }
 0x18d   : > { %1585 = vmatpush.msrb.mxu3 %v1197_v63  ;;  %1566 = vmatmul.f32.vlgmr.msrb.gmra.mxu2 %v2963_v16  ;;  %v814_v54 = vld [vmem:[%s2668_s14 + $0x210] sm:$0xff] }
 0x18e   : > { %1586 = vmatmul.f32.vlgmr.msrb.gmra.mxu3 %v2965_v17  ;;  %1593 = vmatpush.msra.mxu0 %v798_v0  ;;  %v890_v55 = vld [vmem:[%s2668_s14 + $0x470] sm:$0xff] }
 0x18f   : > { %1613 = vmatpush.msra.mxu1 %v862_v1  ;;  %1630 = vmatpush.msra.mxu2 %v938_v2  ;;  %v954_v56 = vld [vmem:[%s2668_s14 + $0x670] sm:$0xff] }
 0x190   : > { %1650 = vmatpush.msra.mxu3 %v1002_v3  ;;  %1594 = vmatpush.msra.mxu0 %v794_v4  ;;  %v1066_v57 = vld [vmem:[%s2668_s14 + $0x9f0] sm:$0xff] }
 0x191   : > { %1614 = vmatpush.msra.mxu1 %v858_v5  ;;  %1631 = vmatpush.msra.mxu2 %v934_v6  ;;  %v1130_v58 = vld [vmem:[%s2668_s14 + $0xbf0] sm:$0xff] }
 0x192   : > { %1651 = vmatpush.msra.mxu3 %v998_v7  ;;  %1595 = vmatpush.msra.mxu0 %v790_v8  ;;  %v886_v62 = vld [vmem:[%s2668_s14 + $0x450] sm:$0xff] }
 0x193   : > { %1615 = vmatpush.msra.mxu1 %v854_v9  ;;  %1632 = vmatpush.msra.mxu2 %v930_v10  ;;  %v950_v63 = vld [vmem:[%s2668_s14 + $0x650] sm:$0xff] }
 0x194   : > { %1652 = vmatpush.msra.mxu3 %v994_v11  ;;  %1596 = vmatpush.msra.mxu0 %v786_v12  ;;  %v1062_v0 = vld [vmem:[%s2668_s14 + $0x9d0] sm:$0xff] }
 0x195   : > { %1616 = vmatpush.msra.mxu1 %v850_v13  ;;  %1633 = vmatpush.msra.mxu2 %v926_v14  ;;  %v1126_v1 = vld [vmem:[%s2668_s14 + $0xbd0] sm:$0xff] }
 0x196   : > { %1653 = vmatpush.msra.mxu3 %v990_v15  ;;  %1597 = vmatpush.msra.mxu0 %v782_v20  ;;  %v882_v2 = vld [vmem:[%s2668_s14 + $0x430] sm:$0xff] }
 0x197   : > { %1617 = vmatpush.msra.mxu1 %v846_v21  ;;  %1634 = vmatpush.msra.mxu2 %v922_v22  ;;  %v946_v3 = vld [vmem:[%s2668_s14 + $0x630] sm:$0xff] }
 0x198   : > { %1654 = vmatpush.msra.mxu3 %v986_v23  ;;  %1598 = vmatpush.msra.mxu0 %v778_v24  ;;  %v1058_v4 = vld [vmem:[%s2668_s14 + $0x9b0] sm:$0xff] }
 0x199   : > { %1618 = vmatpush.msra.mxu1 %v842_v25  ;;  %1635 = vmatpush.msra.mxu2 %v918_v26  ;;  %v1122_v5 = vld [vmem:[%s2668_s14 + $0xbb0] sm:$0xff] }
 0x19a   : > { %1655 = vmatpush.msra.mxu3 %v982_v27  ;;  %1599 = vmatpush.msra.mxu0 %v774_v28  ;;  %v878_v6 = vld [vmem:[%s2668_s14 + $0x410] sm:$0xff] }
 0x19b   : > { %1619 = vmatpush.msra.mxu1 %v838_v29  ;;  %1636 = vmatpush.msra.mxu2 %v914_v30  ;;  %v942_v7 = vld [vmem:[%s2668_s14 + $0x610] sm:$0xff] }
 0x19c   : > { %1656 = vmatpush.msra.mxu3 %v978_v32  ;;  %1600 = vmatpush.msra.mxu0 %v770_v33  ;;  %v1054_v8 = vld [vmem:[%s2668_s14 + $0x990] sm:$0xff] }
 0x19d   : > { %1620 = vmatpush.msra.mxu1 %v834_v34  ;;  %1637 = vmatpush.msra.mxu2 %v910_v35  ;;  %v1118_v9 = vld [vmem:[%s2668_s14 + $0xb90] sm:$0xff] }
 0x19e   : > { %1657 = vmatpush.msra.mxu3 %v974_v40  ;;  %1601 = vmatpush.msra.mxu0 %v766_v36  ;;  %v1194_v10 = vld [vmem:[%s2668_s14 + $0xdf0] sm:$0xff] }
 0x19f   : > { %1621 = vmatpush.msra.mxu1 %v830_v37  ;;  %1638 = vmatpush.msra.mxu2 %v906_v59  ;;  %v1258_v11 = vld [vmem:[%s2668_s14 + $0xff0] sm:$0xff] }
 0x1a0   : > { %1658 = vmatpush.msra.mxu3 %v970_v38  ;;  %1602 = vmatpush.msra.mxu0 %v762_v39  ;;  %v1050_v12 = vld [vmem:[%s2668_s14 + $0x970] sm:$0xff] }
 0x1a1   : > { %1622 = vmatpush.msra.mxu1 %v826_v41  ;;  %1639 = vmatpush.msra.mxu2 %v902_v42  ;;  %v1114_v13 = vld [vmem:[%s2668_s14 + $0xb70] sm:$0xff] }
 0x1a2   : > { %1659 = vmatpush.msra.mxu3 %v966_v43  ;;  %1603 = vmatpush.msra.mxu0 %v758_v44  ;;  %v1190_v14 = vld [vmem:[%s2668_s14 + $0xdd0] sm:$0xff] }
 0x1a3   : > { %1623 = vmatpush.msra.mxu1 %v822_v45  ;;  %1640 = vmatpush.msra.mxu2 %v898_v46  ;;  %v1254_v15 = vld [vmem:[%s2668_s14 + $0xfd0] sm:$0xff] }
 0x1a4   : > { %1660 = vmatpush.msra.mxu3 %v962_v47  ;;  %1604 = vmatpush.msra.mxu0 %v754_v48  ;;  %v1046_v20 = vld [vmem:[%s2668_s14 + $0x950] sm:$0xff] }
 0x1a5   : > { %1624 = vmatpush.msra.mxu1 %v818_v31  ;;  %1641 = vmatpush.msra.mxu2 %v894_v49  ;;  %v1110_v21 = vld [vmem:[%s2668_s14 + $0xb50] sm:$0xff] }
 0x1a6   : > { %1661 = vmatpush.msra.mxu3 %v958_v50  ;;  %1605 = vmatpush.msra.mxu0 %v750_v53  ;;  %v1186_v22 = vld [vmem:[%s2668_s14 + $0xdb0] sm:$0xff] }
 0x1a7   : > { %1625 = vmatpush.msra.mxu1 %v814_v54  ;;  %1642 = vmatpush.msra.mxu2 %v890_v55  ;;  %v1250_v23 = vld [vmem:[%s2668_s14 + $0xfb0] sm:$0xff] }
 0x1a8   : > { %1662 = vmatpush.msra.mxu3 %v954_v56  ;;  %1606 = vmatmul.f32.vlgmr.msra.gmra.mxu0 %v2899_v51  ;;  %v1042_v24 = vld [vmem:[%s2668_s14 + $0x930] sm:$0xff] }
 0x1a9   : > { %1626 = vmatmul.f32.vlgmr.msra.gmra.mxu1 %v2901_v52  ;;  %1670 = vmatpush.msrb.mxu0 %v1066_v57  ;;  %v1106_v25 = vld [vmem:[%s2668_s14 + $0xb30] sm:$0xff] }
 0x1aa   : > { %1690 = vmatpush.msrb.mxu1 %v1130_v58  ;;  %1643 = vmatpush.msra.mxu2 %v886_v62  ;;  %v1182_v26 = vld [vmem:[%s2668_s14 + $0xd90] sm:$0xff] }
 0x1ab   : > { %1663 = vmatpush.msra.mxu3 %v950_v63  ;;  %1671 = vmatpush.msrb.mxu0 %v1062_v0  ;;  %v1246_v27 = vld [vmem:[%s2668_s14 + $0xf90] sm:$0xff] }
 0x1ac   : > { %1691 = vmatpush.msrb.mxu1 %v1126_v1  ;;  %1644 = vmatpush.msra.mxu2 %v882_v2  ;;  %v1038_v28 = vld [vmem:[%s2668_s14 + $0x910] sm:$0xff] }
 0x1ad   : > { %1664 = vmatpush.msra.mxu3 %v946_v3  ;;  %1672 = vmatpush.msrb.mxu0 %v1058_v4  ;;  %v1102_v29 = vld [vmem:[%s2668_s14 + $0xb10] sm:$0xff]  ;;  %v811_v4 = vld [vmem:[%s2668_s14 + $0x1f8] sm:$0xff] }
 0x1ae   : > { %1692 = vmatpush.msrb.mxu1 %v1122_v5  ;;  %1645 = vmatpush.msra.mxu2 %v878_v6  ;;  %v1178_v30 = vld [vmem:[%s2668_s14 + $0xd70] sm:$0xff]  ;;  %v875_v5 = vld [vmem:[%s2668_s14 + $0x3f8] sm:$0xff] }
 0x1af   : > { %1665 = vmatpush.msra.mxu3 %v942_v7  ;;  %1646 = vmatmul.f32.vlgmr.msra.gmra.mxu2 %v2915_v18  ;;  %v1242_v32 = vld [vmem:[%s2668_s14 + $0xf70] sm:$0xff] }
 0x1b0   : > { %1666 = vmatmul.f32.vlgmr.msra.gmra.mxu3 %v2917_v19  ;;  %1673 = vmatpush.msrb.mxu0 %v1054_v8  ;;  %v1034_v33 = vld [vmem:[%s2668_s14 + $0x8f0] sm:$0xff]  ;;  %v807_v8 = vld [vmem:[%s2668_s14 + $0x1d8] sm:$0xff] }
 0x1b1   : > { %1693 = vmatpush.msrb.mxu1 %v1118_v9  ;;  %1710 = vmatpush.msrb.mxu2 %v1194_v10  ;;  %v1098_v34 = vld [vmem:[%s2668_s14 + $0xaf0] sm:$0xff]  ;;  %v871_v9 = vld [vmem:[%s2668_s14 + $0x3d8] sm:$0xff] }
 0x1b2   : > { %1730 = vmatpush.msrb.mxu3 %v1258_v11  ;;  %1674 = vmatpush.msrb.mxu0 %v1050_v12  ;;  %v1174_v35 = vld [vmem:[%s2668_s14 + $0xd50] sm:$0xff]  ;;  %v803_v12 = vld [vmem:[%s2668_s14 + $0x1b8] sm:$0xff] }
 0x1b3   : > { %1694 = vmatpush.msrb.mxu1 %v1114_v13  ;;  %1711 = vmatpush.msrb.mxu2 %v1190_v14  ;;  %v1238_v40 = vld [vmem:[%s2668_s14 + $0xf50] sm:$0xff]  ;;  %v867_v13 = vld [vmem:[%s2668_s14 + $0x3b8] sm:$0xff] }
 0x1b4   : > { %1731 = vmatpush.msrb.mxu3 %v1254_v15  ;;  %1675 = vmatpush.msrb.mxu0 %v1046_v20  ;;  %v1030_v36 = vld [vmem:[%s2668_s14 + $0x8d0] sm:$0xff]  ;;  %v799_v20 = vld [vmem:[%s2668_s14 + $0x198] sm:$0xff] }
 0x1b5   : > { %1695 = vmatpush.msrb.mxu1 %v1110_v21  ;;  %1712 = vmatpush.msrb.mxu2 %v1186_v22  ;;  %v1094_v37 = vld [vmem:[%s2668_s14 + $0xad0] sm:$0xff]  ;;  %v863_v21 = vld [vmem:[%s2668_s14 + $0x398] sm:$0xff] }
 0x1b6   : > { %1732 = vmatpush.msrb.mxu3 %v1250_v23  ;;  %1676 = vmatpush.msrb.mxu0 %v1042_v24  ;;  %v1170_v59 = vld [vmem:[%s2668_s14 + $0xd30] sm:$0xff]  ;;  %v939_v22 = vld [vmem:[%s2668_s14 + $0x5f8] sm:$0xff] }
 0x1b7   : > { %1696 = vmatpush.msrb.mxu1 %v1106_v25  ;;  %1713 = vmatpush.msrb.mxu2 %v1182_v26  ;;  %v1234_v38 = vld [vmem:[%s2668_s14 + $0xf30] sm:$0xff]  ;;  %v1003_v23 = vld [vmem:[%s2668_s14 + $0x7f8] sm:$0xff] }
 0x1b8   : > { %1733 = vmatpush.msrb.mxu3 %v1246_v27  ;;  %1677 = vmatpush.msrb.mxu0 %v1038_v28  ;;  %v1026_v39 = vld [vmem:[%s2668_s14 + $0x8b0] sm:$0xff]  ;;  %v795_v24 = vld [vmem:[%s2668_s14 + $0x178] sm:$0xff] }
 0x1b9   : > { %1697 = vmatpush.msrb.mxu1 %v1102_v29  ;;  %1714 = vmatpush.msrb.mxu2 %v1178_v30  ;;  %v1090_v41 = vld [vmem:[%s2668_s14 + $0xab0] sm:$0xff]  ;;  %v859_v25 = vld [vmem:[%s2668_s14 + $0x378] sm:$0xff] }
 0x1ba   : > { %1734 = vmatpush.msrb.mxu3 %v1242_v32  ;;  %1678 = vmatpush.msrb.mxu0 %v1034_v33  ;;  %v1166_v42 = vld [vmem:[%s2668_s14 + $0xd10] sm:$0xff]  ;;  %v935_v26 = vld [vmem:[%s2668_s14 + $0x5d8] sm:$0xff] }
 0x1bb   : > { %1698 = vmatpush.msrb.mxu1 %v1098_v34  ;;  %1715 = vmatpush.msrb.mxu2 %v1174_v35  ;;  %v1230_v43 = vld [vmem:[%s2668_s14 + $0xf10] sm:$0xff]  ;;  %v999_v27 = vld [vmem:[%s2668_s14 + $0x7d8] sm:$0xff] }
 0x1bc   : > { %1735 = vmatpush.msrb.mxu3 %v1238_v40  ;;  %1679 = vmatpush.msrb.mxu0 %v1030_v36  ;;  %v1022_v44 = vld [vmem:[%s2668_s14 + $0x890] sm:$0xff]  ;;  %v791_v28 = vld [vmem:[%s2668_s14 + $0x158] sm:$0xff] }
 0x1bd   : > { %1699 = vmatpush.msrb.mxu1 %v1094_v37  ;;  %1716 = vmatpush.msrb.mxu2 %v1170_v59  ;;  %v1086_v45 = vld [vmem:[%s2668_s14 + $0xa90] sm:$0xff]  ;;  %v855_v29 = vld [vmem:[%s2668_s14 + $0x358] sm:$0xff] }
 0x1be   : > { %1736 = vmatpush.msrb.mxu3 %v1234_v38  ;;  %1680 = vmatpush.msrb.mxu0 %v1026_v39  ;;  %v1162_v46 = vld [vmem:[%s2668_s14 + $0xcf0] sm:$0xff]  ;;  %v931_v30 = vld [vmem:[%s2668_s14 + $0x5b8] sm:$0xff] }
 0x1bf   : > { %1700 = vmatpush.msrb.mxu1 %v1090_v41  ;;  %v1226_v47 = vld [vmem:[%s2668_s14 + $0xef0] sm:$0xff]  ;;  %1717 = vmatpush.msrb.mxu2 %v1166_v42  ;;  %v995_v32 = vld [vmem:[%s2668_s14 + $0x7b8] sm:$0xff] }
 0x1c0   : > { %1737 = vmatpush.msrb.mxu3 %v1230_v43  ;;  %v1018_v48 = vld [vmem:[%s2668_s14 + $0x870] sm:$0xff]  ;;  %1681 = vmatpush.msrb.mxu0 %v1022_v44  ;;  %v787_v33 = vld [vmem:[%s2668_s14 + $0x138] sm:$0xff] }
 0x1c1   : > { %v1082_v31 = vld [vmem:[%s2668_s14 + $0xa70] sm:$0xff]  ;;  %1701 = vmatpush.msrb.mxu1 %v1086_v45  ;;  %1718 = vmatpush.msrb.mxu2 %v1162_v46  ;;  %v851_v34 = vld [vmem:[%s2668_s14 + $0x338] sm:$0xff] }
 0x1c2   : > { %v1158_v49 = vld [vmem:[%s2668_s14 + $0xcd0] sm:$0xff]  ;;  %1738 = vmatpush.msrb.mxu3 %v1226_v47  ;;  %1682 = vmatpush.msrb.mxu0 %v1018_v48  ;;  %v927_v35 = vld [vmem:[%s2668_s14 + $0x598] sm:$0xff] }
 0x1c3   : > { %v1222_v50 = vld [vmem:[%s2668_s14 + $0xed0] sm:$0xff]  ;;  %1702 = vmatpush.msrb.mxu1 %v1082_v31  ;;  %1719 = vmatpush.msrb.mxu2 %v1158_v49  ;;  %v991_v40 = vld [vmem:[%s2668_s14 + $0x798] sm:$0xff] }
 0x1c4   : > { %v1014_v53 = vld [vmem:[%s2668_s14 + $0x850] sm:$0xff]  ;;  %1739 = vmatpush.msrb.mxu3 %v1222_v50  ;;  %v783_v36 = vld [vmem:[%s2668_s14 + $0x118] sm:$0xff] }
 0x1c5   : > { %v1078_v54 = vld [vmem:[%s2668_s14 + $0xa50] sm:$0xff]  ;;  %1683 = vmatpush.msrb.mxu0 %v1014_v53  ;;  %v847_v37 = vld [vmem:[%s2668_s14 + $0x318] sm:$0xff] }
 0x1c6   : > { %v1154_v55 = vld [vmem:[%s2668_s14 + $0xcb0] sm:$0xff]  ;;  %1703 = vmatpush.msrb.mxu1 %v1078_v54  ;;  %v923_v59 = vld [vmem:[%s2668_s14 + $0x578] sm:$0xff] }
 0x1c7   : > { %v1218_v56 = vld [vmem:[%s2668_s14 + $0xeb0] sm:$0xff]  ;;  %1720 = vmatpush.msrb.mxu2 %v1154_v55  ;;  %v987_v38 = vld [vmem:[%s2668_s14 + $0x778] sm:$0xff] }
 0x1c8   : > { %v1010_v57 = vld [vmem:[%s2668_s14 + $0x830] sm:$0xff]  ;;  %1740 = vmatpush.msrb.mxu3 %v1218_v56  ;;  %v779_v39 = vld [vmem:[%s2668_s14 + $0xf8] sm:$0xff] }
 0x1c9   : > { %v1074_v58 = vld [vmem:[%s2668_s14 + $0xa30] sm:$0xff]  ;;  %1684 = vmatpush.msrb.mxu0 %v1010_v57  ;;  %v843_v41 = vld [vmem:[%s2668_s14 + $0x2f8] sm:$0xff] }
 0x1ca   : > { %v1150_v62 = vld [vmem:[%s2668_s14 + $0xc90] sm:$0xff]  ;;  %1704 = vmatpush.msrb.mxu1 %v1074_v58  ;;  %v919_v42 = vld [vmem:[%s2668_s14 + $0x558] sm:$0xff] }
 0x1cb   : > { %v1214_v63 = vld [vmem:[%s2668_s14 + $0xe90] sm:$0xff]  ;;  %1721 = vmatpush.msrb.mxu2 %v1150_v62  ;;  %v983_v43 = vld [vmem:[%s2668_s14 + $0x758] sm:$0xff] }
 0x1cc   : > { %v1006_v0 = vld [vmem:[%s2668_s14 + $0x810] sm:$0xff]  ;;  %1741 = vmatpush.msrb.mxu3 %v1214_v63  ;;  %v775_v44 = vld [vmem:[%s2668_s14 + $0xd8] sm:$0xff] }
 0x1cd   : > { %v1070_v1 = vld [vmem:[%s2668_s14 + $0xa10] sm:$0xff]  ;;  %1685 = vmatpush.msrb.mxu0 %v1006_v0  ;;  %v839_v45 = vld [vmem:[%s2668_s14 + $0x2d8] sm:$0xff] }
 0x1ce   : > { %v1146_v2 = vld [vmem:[%s2668_s14 + $0xc70] sm:$0xff]  ;;  %1705 = vmatpush.msrb.mxu1 %v1070_v1  ;;  %1686 = vmatmul.f32.vlgmr.msrb.gmra.mxu0 %v2945_v60  ;;  %v915_v46 = vld [vmem:[%s2668_s14 + $0x538] sm:$0xff] }
 0x1cf   : > { %v1210_v3 = vld [vmem:[%s2668_s14 + $0xe70] sm:$0xff]  ;;  %1722 = vmatpush.msrb.mxu2 %v1146_v2  ;;  %1706 = vmatmul.f32.vlgmr.msrb.gmra.mxu1 %v2947_v61  ;;  %v979_v47 = vld [vmem:[%s2668_s14 + $0x738] sm:$0xff] }
 0x1d0   : > { %1742 = vmatpush.msrb.mxu3 %v1210_v3  ;;  %v1142_v6 = vld [vmem:[%s2668_s14 + $0xc50] sm:$0xff]  ;;  %1750 = vmatpush.msra.mxu0 %v811_v4  ;;  %v771_v48 = vld [vmem:[%s2668_s14 + $0xb8] sm:$0xff] }
 0x1d1   : > { %v1206_v7 = vld [vmem:[%s2668_s14 + $0xe50] sm:$0xff]  ;;  %1770 = vmatpush.msra.mxu1 %v875_v5  ;;  %1723 = vmatpush.msrb.mxu2 %v1142_v6  ;;  %v835_v31 = vld [vmem:[%s2668_s14 + $0x2b8] sm:$0xff] }
 0x1d2   : > { %v1138_v10 = vld [vmem:[%s2668_s14 + $0xc30] sm:$0xff]  ;;  %1743 = vmatpush.msrb.mxu3 %v1206_v7  ;;  %1751 = vmatpush.msra.mxu0 %v807_v8  ;;  %v911_v49 = vld [vmem:[%s2668_s14 + $0x518] sm:$0xff] }
 0x1d3   : > { %v1202_v11 = vld [vmem:[%s2668_s14 + $0xe30] sm:$0xff]  ;;  %1771 = vmatpush.msra.mxu1 %v871_v9  ;;  %1724 = vmatpush.msrb.mxu2 %v1138_v10  ;;  %v975_v50 = vld [vmem:[%s2668_s14 + $0x718] sm:$0xff] }
 0x1d4   : > { %v1134_v14 = vld [vmem:[%s2668_s14 + $0xc10] sm:$0xff]  ;;  %1744 = vmatpush.msrb.mxu3 %v1202_v11  ;;  %1752 = vmatpush.msra.mxu0 %v803_v12  ;;  %v767_v53 = vld [vmem:[%s2668_s14 + $0x98] sm:$0xff] }
 0x1d5   : > { %v1198_v15 = vld [vmem:[%s2668_s14 + $0xe10] sm:$0xff]  ;;  %1772 = vmatpush.msra.mxu1 %v867_v13  ;;  %1725 = vmatpush.msrb.mxu2 %v1134_v14  ;;  %v831_v54 = vld [vmem:[%s2668_s14 + $0x298] sm:$0xff] }
 0x1d6   : > { %1745 = vmatpush.msrb.mxu3 %v1198_v15  ;;  %1726 = vmatmul.f32.vlgmr.msrb.gmra.mxu2 %v2963_v16  ;;  %v907_v55 = vld [vmem:[%s2668_s14 + $0x4f8] sm:$0xff] }
 0x1d7   : > { %1746 = vmatmul.f32.vlgmr.msrb.gmra.mxu3 %v2965_v17  ;;  %1753 = vmatpush.msra.mxu0 %v799_v20  ;;  %v971_v56 = vld [vmem:[%s2668_s14 + $0x6f8] sm:$0xff] }
 0x1d8   : > { %1773 = vmatpush.msra.mxu1 %v863_v21  ;;  %1790 = vmatpush.msra.mxu2 %v939_v22  ;;  %v763_v57 = vld [vmem:[%s2668_s14 + $0x78] sm:$0xff] }
 0x1d9   : > { %1810 = vmatpush.msra.mxu3 %v1003_v23  ;;  %1754 = vmatpush.msra.mxu0 %v795_v24  ;;  %v827_v58 = vld [vmem:[%s2668_s14 + $0x278] sm:$0xff] }
 0x1da   : > { %1774 = vmatpush.msra.mxu1 %v859_v25  ;;  %1791 = vmatpush.msra.mxu2 %v935_v26  ;;  %v903_v62 = vld [vmem:[%s2668_s14 + $0x4d8] sm:$0xff] }
 0x1db   : > { %1811 = vmatpush.msra.mxu3 %v999_v27  ;;  %1755 = vmatpush.msra.mxu0 %v791_v28  ;;  %v967_v63 = vld [vmem:[%s2668_s14 + $0x6d8] sm:$0xff] }
 0x1dc   : > { %1775 = vmatpush.msra.mxu1 %v855_v29  ;;  %1792 = vmatpush.msra.mxu2 %v931_v30  ;;  %v759_v0 = vld [vmem:[%s2668_s14 + $0x58] sm:$0xff] }
 0x1dd   : > { %1812 = vmatpush.msra.mxu3 %v995_v32  ;;  %1756 = vmatpush.msra.mxu0 %v787_v33  ;;  %v823_v1 = vld [vmem:[%s2668_s14 + $0x258] sm:$0xff] }
 0x1de   : > { %1776 = vmatpush.msra.mxu1 %v851_v34  ;;  %1793 = vmatpush.msra.mxu2 %v927_v35  ;;  %v899_v2 = vld [vmem:[%s2668_s14 + $0x4b8] sm:$0xff] }
 0x1df   : > { %1813 = vmatpush.msra.mxu3 %v991_v40  ;;  %1757 = vmatpush.msra.mxu0 %v783_v36  ;;  %v963_v3 = vld [vmem:[%s2668_s14 + $0x6b8] sm:$0xff] }
 0x1e0   : > { %1777 = vmatpush.msra.mxu1 %v847_v37  ;;  %1794 = vmatpush.msra.mxu2 %v923_v59  ;;  %v755_v4 = vld [vmem:[%s2668_s14 + $0x38] sm:$0xff] }
 0x1e1   : > { %1814 = vmatpush.msra.mxu3 %v987_v38  ;;  %1758 = vmatpush.msra.mxu0 %v779_v39  ;;  %v819_v5 = vld [vmem:[%s2668_s14 + $0x238] sm:$0xff] }
 0x1e2   : > { %1778 = vmatpush.msra.mxu1 %v843_v41  ;;  %1795 = vmatpush.msra.mxu2 %v919_v42  ;;  %v895_v6 = vld [vmem:[%s2668_s14 + $0x498] sm:$0xff] }
 0x1e3   : > { %1815 = vmatpush.msra.mxu3 %v983_v43  ;;  %1759 = vmatpush.msra.mxu0 %v775_v44  ;;  %v959_v7 = vld [vmem:[%s2668_s14 + $0x698] sm:$0xff] }
 0x1e4   : > { %1779 = vmatpush.msra.mxu1 %v839_v45  ;;  %1796 = vmatpush.msra.mxu2 %v915_v46  ;;  %v751_v8 = vld [vmem:[%s2668_s14 + $0x18] sm:$0xff] }
 0x1e5   : > { %1816 = vmatpush.msra.mxu3 %v979_v47  ;;  %1760 = vmatpush.msra.mxu0 %v771_v48  ;;  %v815_v9 = vld [vmem:[%s2668_s14 + $0x218] sm:$0xff] }
 0x1e6   : > { %1780 = vmatpush.msra.mxu1 %v835_v31  ;;  %1797 = vmatpush.msra.mxu2 %v911_v49  ;;  %v891_v10 = vld [vmem:[%s2668_s14 + $0x478] sm:$0xff] }
 0x1e7   : > { %1817 = vmatpush.msra.mxu3 %v975_v50  ;;  %1761 = vmatpush.msra.mxu0 %v767_v53  ;;  %v955_v11 = vld [vmem:[%s2668_s14 + $0x678] sm:$0xff] }
 0x1e8   : > { %1781 = vmatpush.msra.mxu1 %v831_v54  ;;  %1798 = vmatpush.msra.mxu2 %v907_v55  ;;  %v1067_v12 = vld [vmem:[%s2668_s14 + $0x9f8] sm:$0xff] }
 0x1e9   : > { %1818 = vmatpush.msra.mxu3 %v971_v56  ;;  %1762 = vmatpush.msra.mxu0 %v763_v57  ;;  %v1131_v13 = vld [vmem:[%s2668_s14 + $0xbf8] sm:$0xff] }
 0x1ea   : > { %1782 = vmatpush.msra.mxu1 %v827_v58  ;;  %1799 = vmatpush.msra.mxu2 %v903_v62  ;;  %v887_v14 = vld [vmem:[%s2668_s14 + $0x458] sm:$0xff] }
 0x1eb   : > { %1819 = vmatpush.msra.mxu3 %v967_v63  ;;  %1763 = vmatpush.msra.mxu0 %v759_v0  ;;  %v951_v15 = vld [vmem:[%s2668_s14 + $0x658] sm:$0xff] }
 0x1ec   : > { %1783 = vmatpush.msra.mxu1 %v823_v1  ;;  %1800 = vmatpush.msra.mxu2 %v899_v2  ;;  %v1063_v20 = vld [vmem:[%s2668_s14 + $0x9d8] sm:$0xff] }
 0x1ed   : > { %1820 = vmatpush.msra.mxu3 %v963_v3  ;;  %1764 = vmatpush.msra.mxu0 %v755_v4  ;;  %v1127_v21 = vld [vmem:[%s2668_s14 + $0xbd8] sm:$0xff] }
 0x1ee   : > { %1784 = vmatpush.msra.mxu1 %v819_v5  ;;  %1801 = vmatpush.msra.mxu2 %v895_v6  ;;  %v883_v22 = vld [vmem:[%s2668_s14 + $0x438] sm:$0xff] }
 0x1ef   : > { %1821 = vmatpush.msra.mxu3 %v959_v7  ;;  %1765 = vmatpush.msra.mxu0 %v751_v8  ;;  %v947_v23 = vld [vmem:[%s2668_s14 + $0x638] sm:$0xff] }
 0x1f0   : > { %1785 = vmatpush.msra.mxu1 %v815_v9  ;;  %1802 = vmatpush.msra.mxu2 %v891_v10  ;;  %v1059_v24 = vld [vmem:[%s2668_s14 + $0x9b8] sm:$0xff] }
 0x1f1   : > { %1822 = vmatpush.msra.mxu3 %v955_v11  ;;  %1766 = vmatmul.f32.vlgmr.msra.gmra.mxu0 %v2899_v51  ;;  %v1123_v25 = vld [vmem:[%s2668_s14 + $0xbb8] sm:$0xff] }
 0x1f2   : > { %1786 = vmatmul.f32.vlgmr.msra.gmra.mxu1 %v2901_v52  ;;  %1830 = vmatpush.msrb.mxu0 %v1067_v12  ;;  %v879_v51 = vld [vmem:[%s2668_s14 + $0x418] sm:$0xff] }
 0x1f3   : > { %1850 = vmatpush.msrb.mxu1 %v1131_v13  ;;  %1803 = vmatpush.msra.mxu2 %v887_v14  ;;  %v943_v52 = vld [vmem:[%s2668_s14 + $0x618] sm:$0xff] }
 0x1f4   : > { %1823 = vmatpush.msra.mxu3 %v951_v15  ;;  %1831 = vmatpush.msrb.mxu0 %v1063_v20  ;;  %v1055_v26 = vld [vmem:[%s2668_s14 + $0x998] sm:$0xff] }
 0x1f5   : > { %1851 = vmatpush.msrb.mxu1 %v1127_v21  ;;  %1804 = vmatpush.msra.mxu2 %v883_v22  ;;  %v1119_v27 = vld [vmem:[%s2668_s14 + $0xb98] sm:$0xff] }
 0x1f6   : > { %1824 = vmatpush.msra.mxu3 %v947_v23  ;;  %1832 = vmatpush.msrb.mxu0 %v1059_v24  ;;  %v1195_v28 = vld [vmem:[%s2668_s14 + $0xdf8] sm:$0xff] }
 0x1f7   : > { %1852 = vmatpush.msrb.mxu1 %v1123_v25  ;;  %1805 = vmatpush.msra.mxu2 %v879_v51  ;;  %v1259_v29 = vld [vmem:[%s2668_s14 + $0xff8] sm:$0xff]  ;;  %v1287_v51 = vpop.f32.mrf.mxu0 }
 0x1f8   : > { %1825 = vmatpush.msra.mxu3 %v943_v52  ;;  %1806 = vmatmul.f32.vlgmr.msra.gmra.mxu2 %v2915_v18  ;;  %v1051_v30 = vld [vmem:[%s2668_s14 + $0x978] sm:$0xff]  ;;  %v1307_v52 = vpop.f32.mrf.mxu1 }
 0x1f9   : > { %1826 = vmatmul.f32.vlgmr.msra.gmra.mxu3 %v2917_v19  ;;  %v1115_v32 = vld [vmem:[%s2668_s14 + $0xb78] sm:$0xff]  ;;  %1833 = vmatpush.msrb.mxu0 %v1055_v26 }
 0x1fa   : > { %1853 = vmatpush.msrb.mxu1 %v1119_v27  ;;  %v1191_v33 = vld [vmem:[%s2668_s14 + $0xdd8] sm:$0xff]  ;;  %1870 = vmatpush.msrb.mxu2 %v1195_v28 }
 0x1fb   : > { %v1255_v34 = vld [vmem:[%s2668_s14 + $0xfd8] sm:$0xff]  ;;  %1890 = vmatpush.msrb.mxu3 %v1259_v29  ;;  %1834 = vmatpush.msrb.mxu0 %v1051_v30 }
 0x1fc   : > { %v1047_v35 = vld [vmem:[%s2668_s14 + $0x958] sm:$0xff]  ;;  %1854 = vmatpush.msrb.mxu1 %v1115_v32  ;;  %1871 = vmatpush.msrb.mxu2 %v1191_v33 }
 0x1fd   : > { %v1111_v40 = vld [vmem:[%s2668_s14 + $0xb58] sm:$0xff]  ;;  %1891 = vmatpush.msrb.mxu3 %v1255_v34  ;;  %1835 = vmatpush.msrb.mxu0 %v1047_v35 }
 0x1fe   : > { %v1187_v18 = vld [vmem:[%s2668_s14 + $0xdb8] sm:$0xff]  ;;  %1855 = vmatpush.msrb.mxu1 %v1111_v40 }
 0x1ff   : > { %v1251_v19 = vld [vmem:[%s2668_s14 + $0xfb8] sm:$0xff]  ;;  %1872 = vmatpush.msrb.mxu2 %v1187_v18  ;;  %v1367_v26 = vpop.f32.mrf.mxu0 }
 0x200   : > { %v1043_v36 = vld [vmem:[%s2668_s14 + $0x938] sm:$0xff]  ;;  %1892 = vmatpush.msrb.mxu3 %v1251_v19  ;;  %v1387_v27 = vpop.f32.mrf.mxu1 }
 0x201   : > { %v1107_v37 = vld [vmem:[%s2668_s14 + $0xb38] sm:$0xff]  ;;  %1836 = vmatpush.msrb.mxu0 %v1043_v36 }
 0x202   : > { %v1183_v59 = vld [vmem:[%s2668_s14 + $0xd98] sm:$0xff]  ;;  %1856 = vmatpush.msrb.mxu1 %v1107_v37  ;;  %v1260_v37 = vld [vmem:[%s358_s25] sm:$0xf] }
 0x203   : > { %v1247_v38 = vld [vmem:[%s2668_s14 + $0xf98] sm:$0xff]  ;;  %1873 = vmatpush.msrb.mxu2 %v1183_v59 }
 0x204   : > { %v1039_v39 = vld [vmem:[%s2668_s14 + $0x918] sm:$0xff]  ;;  %1893 = vmatpush.msrb.mxu3 %v1247_v38  ;;  %v1263_v38 = vperm.slane %v1260_v37, 1 }
 0x205   : > { %v1103_v41 = vld [vmem:[%s2668_s14 + $0xb18] sm:$0xff]  ;;  %1837 = vmatpush.msrb.mxu0 %v1039_v39  ;;  %v1264_v39 = vperm.slane %v1260_v37, 2 }
 0x206   : > { %v1179_v42 = vld [vmem:[%s2668_s14 + $0xd78] sm:$0xff]  ;;  %1857 = vmatpush.msrb.mxu1 %v1103_v41 }
 0x207   : > { %v1243_v43 = vld [vmem:[%s2668_s14 + $0xf78] sm:$0xff]  ;;  %1874 = vmatpush.msrb.mxu2 %v1179_v42  ;;  %v1447_v29 = vpop.f32.mrf.mxu0  ;;  %v1262_v42 = vperm.slane %v1260_v37, 0 }
 0x208   : > { %v1035_v44 = vld [vmem:[%s2668_s14 + $0x8f8] sm:$0xff]  ;;  %1894 = vmatpush.msrb.mxu3 %v1243_v43  ;;  %v1467_v32 = vpop.f32.mrf.mxu1  ;;  %v1448_v43 = vadd.f32 %v1447_v29, %v1263_v38 }
 0x209   : > { %v1099_v45 = vld [vmem:[%s2668_s14 + $0xaf8] sm:$0xff]  ;;  %1838 = vmatpush.msrb.mxu0 %v1035_v44 }
 0x20a   : > { %v1175_v46 = vld [vmem:[%s2668_s14 + $0xd58] sm:$0xff]  ;;  %1858 = vmatpush.msrb.mxu1 %v1099_v45 }
 0x20b   : > { %v1239_v47 = vld [vmem:[%s2668_s14 + $0xf58] sm:$0xff]  ;;  %1875 = vmatpush.msrb.mxu2 %v1175_v46 }
 0x20c   : > { %v1031_v48 = vld [vmem:[%s2668_s14 + $0x8d8] sm:$0xff]  ;;  %1895 = vmatpush.msrb.mxu3 %v1239_v47  ;;  %v1265_v47 = vperm.slane %v1260_v37, 3 }
 0x20d   : > { %v1095_v31 = vld [vmem:[%s2668_s14 + $0xad8] sm:$0xff]  ;;  %1839 = vmatpush.msrb.mxu0 %v1031_v48 }
 0x20e   : > { %v1171_v49 = vld [vmem:[%s2668_s14 + $0xd38] sm:$0xff]  ;;  %1859 = vmatpush.msrb.mxu1 %v1095_v31  ;;  %v1288_v31 = vadd.f32 %v1287_v51, %v1262_v42 }
 0x20f   : > { %v1235_v50 = vld [vmem:[%s2668_s14 + $0xf38] sm:$0xff]  ;;  %1876 = vmatpush.msrb.mxu2 %v1171_v49  ;;  %v1527_v34 = vpop.f32.mrf.mxu0  ;;  %v1468_v49 = vadd.f32 %v1467_v32, %v1448_v43 }
 0x210   : > { %v1027_v53 = vld [vmem:[%s2668_s14 + $0x8b8] sm:$0xff]  ;;  %1896 = vmatpush.msrb.mxu3 %v1235_v50  ;;  %v1547_v40 = vpop.f32.mrf.mxu1 }
 0x211   : > { %v1091_v54 = vld [vmem:[%s2668_s14 + $0xab8] sm:$0xff]  ;;  %1840 = vmatpush.msrb.mxu0 %v1027_v53 }
 0x212   : > { %v1167_v55 = vld [vmem:[%s2668_s14 + $0xd18] sm:$0xff]  ;;  %1860 = vmatpush.msrb.mxu1 %v1091_v54 }
 0x213   : > { %v1231_v56 = vld [vmem:[%s2668_s14 + $0xf18] sm:$0xff]  ;;  %1877 = vmatpush.msrb.mxu2 %v1167_v55 }
 0x214   : > { %v1023_v57 = vld [vmem:[%s2668_s14 + $0x898] sm:$0xff]  ;;  %1897 = vmatpush.msrb.mxu3 %v1231_v56  ;;  %v1308_v56 = vadd.f32 %v1307_v52, %v1288_v31 }
 0x215   : > { %v1087_v58 = vld [vmem:[%s2668_s14 + $0xa98] sm:$0xff]  ;;  %1841 = vmatpush.msrb.mxu0 %v1023_v57 }
 0x216   : > { %v1163_v62 = vld [vmem:[%s2668_s14 + $0xcf8] sm:$0xff]  ;;  %1861 = vmatpush.msrb.mxu1 %v1087_v58 }
 0x217   : > { %v1227_v63 = vld [vmem:[%s2668_s14 + $0xef8] sm:$0xff]  ;;  %1878 = vmatpush.msrb.mxu2 %v1163_v62 }
 0x218   : > { %v1019_v0 = vld [vmem:[%s2668_s14 + $0x878] sm:$0xff]  ;;  %1898 = vmatpush.msrb.mxu3 %v1227_v63 }
 0x219   : > { %v1083_v1 = vld [vmem:[%s2668_s14 + $0xa78] sm:$0xff]  ;;  %1842 = vmatpush.msrb.mxu0 %v1019_v0 }
 0x21a   : > { %v1159_v2 = vld [vmem:[%s2668_s14 + $0xcd8] sm:$0xff]  ;;  %1862 = vmatpush.msrb.mxu1 %v1083_v1 }
 0x21b   : > { %v1223_v3 = vld [vmem:[%s2668_s14 + $0xed8] sm:$0xff]  ;;  %1879 = vmatpush.msrb.mxu2 %v1159_v2 }
 0x21c   : > { %v1015_v4 = vld [vmem:[%s2668_s14 + $0x858] sm:$0xff]  ;;  %1899 = vmatpush.msrb.mxu3 %v1223_v3 }
 0x21d   : > { %v1079_v5 = vld [vmem:[%s2668_s14 + $0xa58] sm:$0xff]  ;;  %1843 = vmatpush.msrb.mxu0 %v1015_v4 }
 0x21e   : > { %v1155_v6 = vld [vmem:[%s2668_s14 + $0xcb8] sm:$0xff]  ;;  %1863 = vmatpush.msrb.mxu1 %v1079_v5 }
 0x21f   : > { %v1219_v7 = vld [vmem:[%s2668_s14 + $0xeb8] sm:$0xff]  ;;  %1880 = vmatpush.msrb.mxu2 %v1155_v6 }
 0x220   : > { %v1011_v8 = vld [vmem:[%s2668_s14 + $0x838] sm:$0xff]  ;;  %1900 = vmatpush.msrb.mxu3 %v1219_v7 }
 0x221   : > { %v1075_v9 = vld [vmem:[%s2668_s14 + $0xa38] sm:$0xff]  ;;  %1844 = vmatpush.msrb.mxu0 %v1011_v8 }
 0x222   : > { %v1151_v10 = vld [vmem:[%s2668_s14 + $0xc98] sm:$0xff]  ;;  %1864 = vmatpush.msrb.mxu1 %v1075_v9 }
 0x223   : > { %v1215_v11 = vld [vmem:[%s2668_s14 + $0xe98] sm:$0xff]  ;;  %1881 = vmatpush.msrb.mxu2 %v1151_v10 }
 0x224   : > { %v1007_v12 = vld [vmem:[%s2668_s14 + $0x818] sm:$0xff]  ;;  %1901 = vmatpush.msrb.mxu3 %v1215_v11 }
 0x225   : > { %v1071_v13 = vld [vmem:[%s2668_s14 + $0xa18] sm:$0xff]  ;;  %1845 = vmatpush.msrb.mxu0 %v1007_v12  ;;  %v1607_v18 = vpop.f32.mrf.mxu0 }
 0x226   : > { %v1147_v14 = vld [vmem:[%s2668_s14 + $0xc78] sm:$0xff]  ;;  %1865 = vmatpush.msrb.mxu1 %v1071_v13  ;;  %1846 = vmatmul.f32.vlgmr.msrb.gmra.mxu0 %v2945_v60  ;;  %v1327_v60 = vpop.f32.mrf.mxu2  ;;  %v1627_v19 = vpop.f32.mrf.mxu1  ;;  %v1608_v46 = vadd.f32 %v1607_v18, %v1264_v39 }
 0x227   : > { %v1211_v15 = vld [vmem:[%s2668_s14 + $0xe78] sm:$0xff]  ;;  %1882 = vmatpush.msrb.mxu2 %v1147_v14  ;;  %1866 = vmatmul.f32.vlgmr.msrb.gmra.mxu1 %v2947_v61  ;;  %v1347_v61 = vpop.f32.mrf.mxu3  ;;  %v1328_v63 = vadd.f32 %v1327_v60, %v1308_v56 }
 0x228   : > { %v1143_v20 = vld [vmem:[%s2668_s14 + $0xc58] sm:$0xff]  ;;  %1902 = vmatpush.msrb.mxu3 %v1211_v15  ;;  %v1628_v53 = vadd.f32 %v1627_v19, %v1608_v46 }
 0x229   : > { %v1207_v21 = vld [vmem:[%s2668_s14 + $0xe58] sm:$0xff]  ;;  %1883 = vmatpush.msrb.mxu2 %v1143_v20  ;;  %v1348_v5 = vadd.f32 %v1347_v61, %v1328_v63 }
 0x22a   : > { %v1139_v22 = vld [vmem:[%s2668_s14 + $0xc38] sm:$0xff]  ;;  %1903 = vmatpush.msrb.mxu3 %v1207_v21 }
 0x22b   : > { %v1203_v23 = vld [vmem:[%s2668_s14 + $0xe38] sm:$0xff]  ;;  %1884 = vmatpush.msrb.mxu2 %v1139_v22  ;;  %v1368_v11 = vadd.f32 %v1367_v26, %v1348_v5  ;;  %v1924_v26 = vlaneseq }
 0x22c   : > { %v1135_v24 = vld [vmem:[%s2668_s14 + $0xc18] sm:$0xff]  ;;  %1904 = vmatpush.msrb.mxu3 %v1203_v23 }
 0x22d   : > { %v1199_v25 = vld [vmem:[%s2668_s14 + $0xe18] sm:$0xff]  ;;  %1885 = vmatpush.msrb.mxu2 %v1135_v24  ;;  %v1388_v21 = vadd.f32 %v1387_v27, %v1368_v11  ;;  %vm1926_vm4 = vcmp.lt.s32.totalorder %v1924_v26, 512 }
 0x22e   : > { %1905 = vmatpush.msrb.mxu3 %v1199_v25  ;;  %1886 = vmatmul.f32.vlgmr.msrb.gmra.mxu2 %v2963_v16  ;;  %v1407_v28 = vpop.f32.mrf.mxu2 }
 0x22f   : > { %1906 = vmatmul.f32.vlgmr.msrb.gmra.mxu3 %v2965_v17  ;;  %v3339_v30 = vpop.f32.mrf.mxu3  ;;  %v1408_v25 = vadd.f32 %v1407_v28, %v1388_v21 }
 0x231   : > { %v1428_v27 = vadd.f32 %v3339_v30, %v1408_v25 }
 0x236   : > { %v1487_v33 = vpop.f32.mrf.mxu2 }
 0x237   : > { %v1507_v35 = vpop.f32.mrf.mxu3  ;;  %v1488_v50 = vadd.f32 %v1487_v33, %v1468_v49 }
 0x239   : > { %v1508_v0 = vadd.f32 %v1507_v35, %v1488_v50 }
 0x23b   : > { %v1528_v2 = vadd.f32 %v1527_v34, %v1508_v0 }
 0x23d   : > { %v1548_v9 = vadd.f32 %v1547_v40, %v1528_v2 }
 0x23e   : > { %v1567_v16 = vpop.f32.mrf.mxu2 }
 0x23f   : > { %v1587_v17 = vpop.f32.mrf.mxu3  ;;  %v1568_v12 = vadd.f32 %v1567_v16, %v1548_v9 }
 0x241   : > { %v1588_v22 = vadd.f32 %v1587_v17, %v1568_v12 }
 0x243   : > { %v1914_v61 = vrot.slane %v1588_v22, 7 }
 0x245   : > { %v1918_v33 = vsel %vm1917_vm1, %v1428_v27, %v1914_v61 }
 0x246   : > { %v1647_v36 = vpop.f32.mrf.mxu2 }
 0x247   : > { %v1667_v41 = vpop.f32.mrf.mxu3  ;;  %v1648_v57 = vadd.f32 %v1647_v36, %v1628_v53 }
 0x249   : > { %v1668_v3 = vadd.f32 %v1667_v41, %v1648_v57 }
 0x24b   : > { %v1687_v59 = vpop.f32.mrf.mxu0 }
 0x24c   : > { %v1707_v44 = vpop.f32.mrf.mxu1  ;;  %v1688_v6 = vadd.f32 %v1687_v59, %v1668_v3 }
 0x24e   : > { %v1708_v13 = vadd.f32 %v1707_v44, %v1688_v6 }
 0x259   : > { %v1727_v45 = vpop.f32.mrf.mxu2 }
 0x25a   : > { %v1747_v55 = vpop.f32.mrf.mxu3  ;;  %v1728_v15 = vadd.f32 %v1727_v45, %v1708_v13 }
 0x25c   : > { %v1748_v51 = vadd.f32 %v1747_v55, %v1728_v15 }
 0x25e   : > { %v1915_v28 = vrot.slane %v1748_v51, 6 }
 0x26e   : > { %v1767_v48 = vpop.f32.mrf.mxu0 }
 0x26f   : > { %v1768_v54 = vadd.f32 %v1767_v48, %v1265_v47  ;;  %v1787_v58 = vpop.f32.mrf.mxu1 }
 0x271   : > { %v1788_v1 = vadd.f32 %v1787_v58, %v1768_v54 }
 0x27b   : > { %v1807_v62 = vpop.f32.mrf.mxu2 }
 0x27c   : > { %v1808_v4 = vadd.f32 %v1807_v62, %v1788_v1  ;;  %v1827_v7 = vpop.f32.mrf.mxu3 }
 0x27e   : > { %v1828_v10 = vadd.f32 %v1827_v7, %v1808_v4 }
 0x2a3   : > { %v1847_v8 = vpop.f32.mrf.mxu0 }
 0x2a4   : > { %v1848_v14 = vadd.f32 %v1847_v8, %v1828_v10  ;;  %v1867_v20 = vpop.f32.mrf.mxu1 }
 0x2a6   : > { %v1868_v23 = vadd.f32 %v1867_v20, %v1848_v14 }
 0x2b1   : > { %v1887_v24 = vpop.f32.mrf.mxu2 }
 0x2b2   : > { %v1888_v52 = vadd.f32 %v1887_v24, %v1868_v23  ;;  %v1907_v60 = vpop.f32.mrf.mxu3 }
 0x2b4   : > { %v1908_v29 = vadd.f32 %v1907_v60, %v1888_v52 }
 0x2b6   : > { %v1916_v32 = vrot.slane %v1908_v29, 5 }
 0x2b8   : > { %v1920_v34 = vsel %vm1919_vm2, %v1915_v28, %v1916_v32 }
 0x2b9   : > { %v1922_v35 = vsel %vm1921_vm3, %v1918_v33, %v1920_v34 }
 0x2ba   : > { %1928 = vst.msk [vmem:[%s402_s13] sm:$0xf] %vm1926_vm4, %v1922_v35 }
 0x2bb   : > { %2391 = shalt.err (!%p2388_p1)
}
 0x2bc   : > { %2145 = dma.vmem_to_hbm [thread:$0]  (%p2593_p7), %s1943_s11, 64, %s1945_s12, %s1930_s2  }
 0x2bd PF: > { %s1956_s9 = sand.u32 1, %s2426_s21   ;;  %p3404_p2 = scmp.ge.s32.totalorder %s2438_s24, 2 }
 0x2be   : > { %s1957_s28 = scalar_lea.sflag [#allocation4], %s1956_s9 }
 0x2bf   : > { %p2165_p5 = pnand %p3404_p2, %p2597_p9 }
 0x2c1   : > { %p2166_p10 = pneg %p2165_p5 }
 0x2c3   : > { %2421 = dma.done.wait (%p2166_p10), %s1957_s28, 64  }
 0x2c4   : > { %2423 = vsyncadd (%p2166_p10), %s1957_s28, 4294967232  ;;  %s3405_s24 = sld [smem:[#allocation17_spill]]  ;;  %s3408_s21 = smov %s2430_s22 }
 0x2c5   : > { %s3406_s17 = sld [smem:[#allocation16_spill]] }
 0x2c6   : > { %s3407_s23 = sld [smem:[#allocation18_spill]] }
 0x2ca   : > { %p23_p0 = scmp.ge.s32.totalorder %s3405_s24, 4  }
 0x2cb   : > { %s3409_s22 = smov %s3406_s17 }
 0x2cc   :  { %25 = sbr.rel (!%p23_p0) target bundleno = 12 (0xc), region = 129 }
 0x2d1   :  { %1963 = vsyncpa [#allocation3], 1 }
 0x2d2   :  { %1965 = vsyncpa [#allocation3 + $0x1], 1 }
 0x2d3   :  { %1966 = vsyncpa [#allocation6], 1 }
 0x2d4   :  { %1968 = vsyncpa [#allocation6 + $0x1], 1 }
 0x2d5   :  { %1969 = vsyncpa [#allocation9], 1 }
 0x2d6   :  { %1971 = vsyncpa [#allocation9 + $0x1], 1 }
 0x2d7   :  { %1972 = vsyncpa [#allocation4], 1 }
 0x2d8   :  { %1974 = vsyncpa [#allocation4 + $0x1], 1 }

</bundles_post_ra>
